<compile_context>
chip_gen: v6e
topology: v6e:2x2x1
jax: 0.10.0
libtpu: 0.0.40
codegen_flags: <defaults>
</compile_context>

<pallas_src>
import functools

import jax
import jax.numpy as jnp
from jax.experimental import pallas as pl
from jax.experimental.pallas import tpu as pltpu


def _softplus_and_sigmoid(z):
    """Shared-exp softplus + sigmoid: one EUP exp per element instead of two."""
    e = jnp.exp(-jnp.abs(z))
    # NOTE: pl.reciprocal(1.0 + e, approx=True) would drop the VALU Newton
    # refinement, but its ~2^-12 relative error is marginal vs the 1e-4 reference
    # tolerance once it compounds through the backward chain; kept exact.
    inv = 1.0 / (1.0 + e)
    sig = jnp.where(z >= 0.0, inv, e * inv)           # sigmoid(z) = softplus'(z)
    sp = jnp.maximum(z, 0.0) + jnp.log1p(e)           # softplus(z), stable
    return sp, sig


def _dot(a, b):
    return jnp.dot(a, b, preferred_element_type=jnp.float32)


def jacvector_kernel(layers,
                     x_ref, w1_ref, w1t_ref, b1_ref,
                     wh_ref, wht_ref, bh_ref,
                     whead_ref, bhead_ref, wct_ref,
                     out_ref,
                     sig_ref):
    x = x_ref[...]                                            # (3, TB)

    # ---------------- forward ----------------
    z = _dot(w1_ref[...], x) + b1_ref[...]                    # (N, TB)
    a, sig = _softplus_and_sigmoid(z)
    sig_ref[0] = sig
    for i in range(layers - 1):                               # statically unrolled
        z = _dot(wh_ref[i], a) + bh_ref[i]                    # (N, TB)
        a, sig = _softplus_and_sigmoid(z)
        sig_ref[i + 1] = sig

    head = _dot(whead_ref[...], a) + bhead_ref[...]           # (2, TB) fused heads
    multi = head[0:1, :]                                      # (1, TB)
    cass = head[1:2, :]                                       # (1, TB)

    # ---------- backward: d(sum(cass)) / d(inp) ----------
    # Seed = wc^T broadcast over the batch lanes, fused directly into the first
    # elementwise multiply (no (N, TB) broadcast slab materialized).
    g = wct_ref[...] * sig_ref[layers - 1]                    # (N, TB)
    for i in range(layers - 2, -1, -1):
        g = _dot(wht_ref[i], g)                               # through hidden linear
        g = g * sig_ref[i]                                    # through softplus
    cass_grad = _dot(w1t_ref[...], g)                         # (3, TB)

    # Single fused output block: rows 0-2 = multi * cass_grad, row 3 = cass.
    out_ref[...] = jnp.concatenate([multi * cass_grad, cass],
                                   axis=0).astype(out_ref.dtype)


@functools.partial(jax.jit, static_argnames=("layers", "tb"))
def jacvectornet_forward(inp, params, layers, tb=256):
    B = inp.shape[0]
    n = params["w1"].shape[0]

    # ---- host-side repack (one-time, tiny relative to the kernel) ----
    x_t = inp.astype(jnp.float32).T                           # (3, B)  batch -> lanes
    bp = pl.cdiv(B, tb) * tb
    if bp != B:
        x_t = jnp.pad(x_t, ((0, 0), (0, bp - B)))             # pad cols, slice later

    w1 = params["w1"]                                         # (N, 3)   forward
    w1t = params["w1"].T                                      # (3, N)   backward
    b1 = params["b1"].T                                       # (N, 1)
    wh = params["wh"]                                         # (L-1, N, N)
    wht = jnp.swapaxes(params["wh"], 1, 2)                    # pre-transposed backward
    bh = jnp.swapaxes(params["bh"], 1, 2)                     # (L-1, N, 1)
    whead = jnp.concatenate([params["wm"], params["wc"]], 0)  # (2, N)  fused heads
    bhead = jnp.concatenate([params["bm"], params["bc"]], 0)  # (2, 1)
    wct = params["wc"].T                                      # (N, 1)  backward seed

    const = lambda ndim: (lambda i: (0,) * ndim)
    kernel = functools.partial(jacvector_kernel, layers)

    out_t = pl.pallas_call(
        kernel,
        out_shape=jax.ShapeDtypeStruct((4, bp), jnp.float32),
        grid_spec=pltpu.PrefetchScalarGridSpec(
            num_scalar_prefetch=0,
            grid=(bp // tb,),
            in_specs=[
                pl.BlockSpec((3, tb), lambda i: (0, i)),      # input tile (pipelined)
                pl.BlockSpec(w1.shape, const(2)),             # weights: VMEM-resident
                pl.BlockSpec(w1t.shape, const(2)),
                pl.BlockSpec(b1.shape, const(2)),
                pl.BlockSpec(wh.shape, const(3)),
                pl.BlockSpec(wht.shape, const(3)),
                pl.BlockSpec(bh.shape, const(3)),
                pl.BlockSpec(whead.shape, const(2)),
                pl.BlockSpec(bhead.shape, const(2)),
                pl.BlockSpec(wct.shape, const(2)),
            ],
            out_specs=pl.BlockSpec((4, tb), lambda i: (0, i)),  # single fused DMA
            scratch_shapes=[pltpu.VMEM((layers, n, tb), jnp.float32)],
        ),
        compiler_params=pltpu.CompilerParams(
            dimension_semantics=("parallel",)),               # megacore split on v7x
    )(x_t, w1, w1t, b1, wh, wht, bh, whead, bhead, wct)

    combined = out_t[:, :B].T                                 # (B, 4), one unpack pass
    out1 = combined[:, :3]                                    # multi * cass_grad
    cass = combined[:, 3:4]                                   # cassimir head
    return out1, cass


def ref_forward(inp, params, layers):
    """Pure-JAX reference (uses jax.grad, mirrors torch.autograd.grad)."""
    def hidden_stack(x):
        h = jax.nn.softplus(params["w1"] @ x + params["b1"][0])
        for i in range(layers - 1):
            h = jax.nn.softplus(params["wh"][i] @ h + params["bh"][i, 0])
        return h

    def cass_fn(x):
        return params["wc"][0] @ hidden_stack(x) + params["bc"][0, 0]

    def multi_fn(x):
        return params["wm"][0] @ hidden_stack(x) + params["bm"][0, 0]

    cass = jax.vmap(cass_fn)(inp)[:, None]
    multi = jax.vmap(multi_fn)(inp)[:, None]
    grad = jax.vmap(jax.grad(cass_fn))(inp)
    return multi * grad, cass


if __name__ == "__main__":
    dim, neurons, layers = 3, 32, 3
    batch, tb = 512, 256                      # grid of 2 batch tiles (even -> both v7x TCs)

    key = jax.random.PRNGKey(0)
    keys = jax.random.split(key, 10)

    def uinit(k, shape, fan_in):
        bound = 1.0 / jnp.sqrt(jnp.float32(fan_in))
        return jax.random.uniform(k, shape, jnp.float32, -bound, bound)

    params = {
        "w1": uinit(keys[0], (neurons, 3), 3),
        "b1": uinit(keys[1], (1, neurons), 3),
        "wh": uinit(keys[2], (layers - 1, neurons, neurons), neurons),
        "bh": uinit(keys[3], (layers - 1, 1, neurons), neurons),
        "wm": uinit(keys[4], (1, neurons), neurons),
        "bm": uinit(keys[5], (1, 1), neurons),
        "wc": uinit(keys[6], (1, neurons), neurons),
        "bc": uinit(keys[7], (1, 1), neurons),
    }

    inp = jax.random.normal(keys[8], (batch, 3), jnp.float32)

    out1, cass = jacvectornet_forward(inp, params, layers=layers, tb=tb)
    jax.block_until_ready((out1, cass))

    r1, r2 = ref_forward(inp, params, layers)
    assert jnp.allclose(out1, r1, atol=1e-4, rtol=1e-4), "multi * cass_grad mismatch"
    assert jnp.allclose(cass, r2, atol=1e-4, rtol=1e-4), "cass mismatch"

    print("KERNEL_OK")
</pallas_src>

<mosaic_0001>
module attributes {stable_mosaic.version = 11 : i64} {
  func.func @jacvector_kernel(%arg0: i32, %arg1: memref<3x256xf32, #tpu.memory_space<vmem>>, %arg2: memref<32x3xf32, #tpu.memory_space<vmem>>, %arg3: memref<3x32xf32, #tpu.memory_space<vmem>>, %arg4: memref<32x1xf32, #tpu.memory_space<vmem>>, %arg5: memref<2x32x32xf32, #tpu.memory_space<vmem>>, %arg6: memref<2x32x32xf32, #tpu.memory_space<vmem>>, %arg7: memref<2x32x1xf32, #tpu.memory_space<vmem>>, %arg8: memref<2x32xf32, #tpu.memory_space<vmem>>, %arg9: memref<2x1xf32, #tpu.memory_space<vmem>>, %arg10: memref<32x1xf32, #tpu.memory_space<vmem>>, %arg11: memref<4x256xf32, #tpu.memory_space<vmem>>, %arg12: memref<3x32x256xf32, #tpu.memory_space<vmem>>) attributes {dimension_semantics = [#tpu.dimension_semantics<parallel>], iteration_bounds = array<i64: 2>, scalar_prefetch = 0 : i64, scratch_operands = 1 : i64, tpu.core_type = #tpu.core_type<tc>, window_params = [{transform_indices = @transform_0, window_bounds = array<i64: 3, 256>}, {pipeline_mode = #tpu.pipeline_mode<synchronous>, transform_indices = @transform_1, window_bounds = array<i64: 32, 3>}, {pipeline_mode = #tpu.pipeline_mode<synchronous>, transform_indices = @transform_2, window_bounds = array<i64: 3, 32>}, {pipeline_mode = #tpu.pipeline_mode<synchronous>, transform_indices = @transform_3, window_bounds = array<i64: 32, 1>}, {pipeline_mode = #tpu.pipeline_mode<synchronous>, transform_indices = @transform_4, window_bounds = array<i64: 2, 32, 32>}, {pipeline_mode = #tpu.pipeline_mode<synchronous>, transform_indices = @transform_5, window_bounds = array<i64: 2, 32, 32>}, {pipeline_mode = #tpu.pipeline_mode<synchronous>, transform_indices = @transform_6, window_bounds = array<i64: 2, 32, 1>}, {pipeline_mode = #tpu.pipeline_mode<synchronous>, transform_indices = @transform_7, window_bounds = array<i64: 2, 32>}, {pipeline_mode = #tpu.pipeline_mode<synchronous>, transform_indices = @transform_8, window_bounds = array<i64: 2, 1>}, {pipeline_mode = #tpu.pipeline_mode<synchronous>, transform_indices = @transform_9, window_bounds = array<i64: 32, 1>}, {transform_indices = @transform_10, window_bounds = array<i64: 4, 256>}]} {
    %c0 = arith.constant 0 : index
    %c0_0 = arith.constant 0 : index
    %0 = vector.load %arg1[%c0, %c0_0] : memref<3x256xf32, #tpu.memory_space<vmem>>, vector<3x256xf32>
    %c0_1 = arith.constant 0 : index
    %c0_2 = arith.constant 0 : index
    %1 = vector.load %arg2[%c0_1, %c0_2] : memref<32x3xf32, #tpu.memory_space<vmem>>, vector<32x3xf32>
    %cst = arith.constant dense<0.000000e+00> : vector<32x256xf32>
    %2 = tpu.matmul %1, %0, %cst {dimension_numbers = #tpu.dot_dimension_numbers<[1], [0], [0], [1], [0, 0, 1, 1], [], []>} : vector<32x3xf32>, vector<3x256xf32>, vector<32x256xf32> -> vector<32x256xf32>
    %c0_3 = arith.constant 0 : index
    %c0_4 = arith.constant 0 : index
    %3 = vector.load %arg4[%c0_3, %c0_4] : memref<32x1xf32, #tpu.memory_space<vmem>>, vector<32x1xf32>
    %4 = vector.broadcast %3 : vector<32x1xf32> to vector<32x256xf32>
    %5 = arith.addf %2, %4 : vector<32x256xf32>
    %6 = math.absf %5 : vector<32x256xf32>
    %cst_5 = arith.constant 0.000000e+00 : f32
    %7 = vector.broadcast %cst_5 : f32 to vector<32x256xf32>
    %8 = arith.subf %7, %6 : vector<32x256xf32>
    %9 = math.exp %8 : vector<32x256xf32>
    %cst_6 = arith.constant 1.000000e+00 : f32
    %10 = vector.broadcast %cst_6 : f32 to vector<32x256xf32>
    %11 = arith.addf %10, %9 : vector<32x256xf32>
    %cst_7 = arith.constant 1.000000e+00 : f32
    %12 = vector.broadcast %cst_7 : f32 to vector<32x256xf32>
    %13 = arith.divf %12, %11 : vector<32x256xf32>
    %cst_8 = arith.constant 0.000000e+00 : f32
    %14 = vector.broadcast %cst_8 : f32 to vector<32x256xf32>
    %15 = arith.cmpf oge, %5, %14 : vector<32x256xf32>
    %16 = arith.mulf %9, %13 : vector<32x256xf32>
    %17 = arith.select %15, %13, %16 : vector<32x256xi1>, vector<32x256xf32>
    %cst_9 = arith.constant 0.000000e+00 : f32
    %18 = vector.broadcast %cst_9 : f32 to vector<32x256xf32>
    %19 = arith.maximumf %5, %18 : vector<32x256xf32>
    %20 = math.log1p %9 : vector<32x256xf32>
    %21 = arith.addf %19, %20 : vector<32x256xf32>
    %c0_10 = arith.constant 0 : index
    %c0_11 = arith.constant 0 : index
    %c0_12 = arith.constant 0 : index
    %22 = vector.load %arg12[%c0_10, %c0_11, %c0_12] : memref<3x32x256xf32, #tpu.memory_space<vmem>>, vector<1x32x256xf32>
    %23 = vector.shape_cast %22 : vector<1x32x256xf32> to vector<32x256xf32>
    %24 = vector.shape_cast %17 : vector<32x256xf32> to vector<1x32x256xf32>
    tpu.vector_store %arg12[%c0_10, %c0_11, %c0_12], %24 {strides = array<i32>} : memref<3x32x256xf32, #tpu.memory_space<vmem>>, vector<1x32x256xf32>,
    %c0_13 = arith.constant 0 : index
    %c0_14 = arith.constant 0 : index
    %c0_15 = arith.constant 0 : index
    %25 = vector.load %arg5[%c0_13, %c0_14, %c0_15] : memref<2x32x32xf32, #tpu.memory_space<vmem>>, vector<1x32x32xf32>
    %26 = vector.shape_cast %25 : vector<1x32x32xf32> to vector<32x32xf32>
    %cst_16 = arith.constant dense<0.000000e+00> : vector<32x256xf32>
    %27 = tpu.matmul %26, %21, %cst_16 {dimension_numbers = #tpu.dot_dimension_numbers<[1], [0], [0], [1], [0, 0, 1, 1], [], []>} : vector<32x32xf32>, vector<32x256xf32>, vector<32x256xf32> -> vector<32x256xf32>
    %c0_17 = arith.constant 0 : index
    %c0_18 = arith.constant 0 : index
    %c0_19 = arith.constant 0 : index
    %28 = vector.load %arg7[%c0_17, %c0_18, %c0_19] : memref<2x32x1xf32, #tpu.memory_space<vmem>>, vector<1x32x1xf32>
    %29 = vector.shape_cast %28 : vector<1x32x1xf32> to vector<32x1xf32>
    %30 = vector.broadcast %29 : vector<32x1xf32> to vector<32x256xf32>
    %31 = arith.addf %27, %30 : vector<32x256xf32>
    %32 = math.absf %31 : vector<32x256xf32>
    %cst_20 = arith.constant 0.000000e+00 : f32
    %33 = vector.broadcast %cst_20 : f32 to vector<32x256xf32>
    %34 = arith.subf %33, %32 : vector<32x256xf32>
    %35 = math.exp %34 : vector<32x256xf32>
    %cst_21 = arith.constant 1.000000e+00 : f32
    %36 = vector.broadcast %cst_21 : f32 to vector<32x256xf32>
    %37 = arith.addf %36, %35 : vector<32x256xf32>
    %cst_22 = arith.constant 1.000000e+00 : f32
    %38 = vector.broadcast %cst_22 : f32 to vector<32x256xf32>
    %39 = arith.divf %38, %37 : vector<32x256xf32>
    %cst_23 = arith.constant 0.000000e+00 : f32
    %40 = vector.broadcast %cst_23 : f32 to vector<32x256xf32>
    %41 = arith.cmpf oge, %31, %40 : vector<32x256xf32>
    %42 = arith.mulf %35, %39 : vector<32x256xf32>
    %43 = arith.select %41, %39, %42 : vector<32x256xi1>, vector<32x256xf32>
    %cst_24 = arith.constant 0.000000e+00 : f32
    %44 = vector.broadcast %cst_24 : f32 to vector<32x256xf32>
    %45 = arith.maximumf %31, %44 : vector<32x256xf32>
    %46 = math.log1p %35 : vector<32x256xf32>
    %47 = arith.addf %45, %46 : vector<32x256xf32>
    %c1 = arith.constant 1 : index
    %c0_25 = arith.constant 0 : index
    %c0_26 = arith.constant 0 : index
    %48 = vector.load %arg12[%c1, %c0_25, %c0_26] : memref<3x32x256xf32, #tpu.memory_space<vmem>>, vector<1x32x256xf32>
    %49 = vector.shape_cast %48 : vector<1x32x256xf32> to vector<32x256xf32>
    %50 = vector.shape_cast %43 : vector<32x256xf32> to vector<1x32x256xf32>
    tpu.vector_store %arg12[%c1, %c0_25, %c0_26], %50 {strides = array<i32>} : memref<3x32x256xf32, #tpu.memory_space<vmem>>, vector<1x32x256xf32>,
    %c1_27 = arith.constant 1 : index
    %c0_28 = arith.constant 0 : index
    %c0_29 = arith.constant 0 : index
    %51 = vector.load %arg5[%c1_27, %c0_28, %c0_29] : memref<2x32x32xf32, #tpu.memory_space<vmem>>, vector<1x32x32xf32>
    %52 = vector.shape_cast %51 : vector<1x32x32xf32> to vector<32x32xf32>
    %cst_30 = arith.constant dense<0.000000e+00> : vector<32x256xf32>
    %53 = tpu.matmul %52, %47, %cst_30 {dimension_numbers = #tpu.dot_dimension_numbers<[1], [0], [0], [1], [0, 0, 1, 1], [], []>} : vector<32x32xf32>, vector<32x256xf32>, vector<32x256xf32> -> vector<32x256xf32>
    %c1_31 = arith.constant 1 : index
    %c0_32 = arith.constant 0 : index
    %c0_33 = arith.constant 0 : index
    %54 = vector.load %arg7[%c1_31, %c0_32, %c0_33] : memref<2x32x1xf32, #tpu.memory_space<vmem>>, vector<1x32x1xf32>
    %55 = vector.shape_cast %54 : vector<1x32x1xf32> to vector<32x1xf32>
    %56 = vector.broadcast %55 : vector<32x1xf32> to vector<32x256xf32>
    %57 = arith.addf %53, %56 : vector<32x256xf32>
    %58 = math.absf %57 : vector<32x256xf32>
    %cst_34 = arith.constant 0.000000e+00 : f32
    %59 = vector.broadcast %cst_34 : f32 to vector<32x256xf32>
    %60 = arith.subf %59, %58 : vector<32x256xf32>
    %61 = math.exp %60 : vector<32x256xf32>
    %cst_35 = arith.constant 1.000000e+00 : f32
    %62 = vector.broadcast %cst_35 : f32 to vector<32x256xf32>
    %63 = arith.addf %62, %61 : vector<32x256xf32>
    %cst_36 = arith.constant 1.000000e+00 : f32
    %64 = vector.broadcast %cst_36 : f32 to vector<32x256xf32>
    %65 = arith.divf %64, %63 : vector<32x256xf32>
    %cst_37 = arith.constant 0.000000e+00 : f32
    %66 = vector.broadcast %cst_37 : f32 to vector<32x256xf32>
    %67 = arith.cmpf oge, %57, %66 : vector<32x256xf32>
    %68 = arith.mulf %61, %65 : vector<32x256xf32>
    %69 = arith.select %67, %65, %68 : vector<32x256xi1>, vector<32x256xf32>
    %cst_38 = arith.constant 0.000000e+00 : f32
    %70 = vector.broadcast %cst_38 : f32 to vector<32x256xf32>
    %71 = arith.maximumf %57, %70 : vector<32x256xf32>
    %72 = math.log1p %61 : vector<32x256xf32>
    %73 = arith.addf %71, %72 : vector<32x256xf32>
    %c2 = arith.constant 2 : index
    %c0_39 = arith.constant 0 : index
    %c0_40 = arith.constant 0 : index
    %74 = vector.load %arg12[%c2, %c0_39, %c0_40] : memref<3x32x256xf32, #tpu.memory_space<vmem>>, vector<1x32x256xf32>
    %75 = vector.shape_cast %74 : vector<1x32x256xf32> to vector<32x256xf32>
    %76 = vector.shape_cast %69 : vector<32x256xf32> to vector<1x32x256xf32>
    tpu.vector_store %arg12[%c2, %c0_39, %c0_40], %76 {strides = array<i32>} : memref<3x32x256xf32, #tpu.memory_space<vmem>>, vector<1x32x256xf32>,
    %c0_41 = arith.constant 0 : index
    %c0_42 = arith.constant 0 : index
    %77 = vector.load %arg8[%c0_41, %c0_42] : memref<2x32xf32, #tpu.memory_space<vmem>>, vector<2x32xf32>
    %cst_43 = arith.constant dense<0.000000e+00> : vector<2x256xf32>
    %78 = tpu.matmul %77, %73, %cst_43 {dimension_numbers = #tpu.dot_dimension_numbers<[1], [0], [0], [1], [0, 0, 1, 1], [], []>} : vector<2x32xf32>, vector<32x256xf32>, vector<2x256xf32> -> vector<2x256xf32>
    %c0_44 = arith.constant 0 : index
    %c0_45 = arith.constant 0 : index
    %79 = vector.load %arg9[%c0_44, %c0_45] : memref<2x1xf32, #tpu.memory_space<vmem>>, vector<2x1xf32>
    %80 = vector.broadcast %79 : vector<2x1xf32> to vector<2x256xf32>
    %81 = arith.addf %78, %80 : vector<2x256xf32>
    %82 = vector.extract_strided_slice %81 {offsets = [0, 0], sizes = [1, 256], strides = [1, 1]} : vector<2x256xf32> to vector<1x256xf32>
    %83 = vector.extract_strided_slice %81 {offsets = [1, 0], sizes = [1, 256], strides = [1, 1]} : vector<2x256xf32> to vector<1x256xf32>
    %c0_46 = arith.constant 0 : index
    %c0_47 = arith.constant 0 : index
    %84 = vector.load %arg10[%c0_46, %c0_47] : memref<32x1xf32, #tpu.memory_space<vmem>>, vector<32x1xf32>
    %c2_48 = arith.constant 2 : index
    %c0_49 = arith.constant 0 : index
    %c0_50 = arith.constant 0 : index
    %85 = vector.load %arg12[%c2_48, %c0_49, %c0_50] : memref<3x32x256xf32, #tpu.memory_space<vmem>>, vector<1x32x256xf32>
    %86 = vector.shape_cast %85 : vector<1x32x256xf32> to vector<32x256xf32>
    %87 = vector.broadcast %84 : vector<32x1xf32> to vector<32x256xf32>
    %88 = arith.mulf %87, %86 : vector<32x256xf32>
    %c1_51 = arith.constant 1 : index
    %c0_52 = arith.constant 0 : index
    %c0_53 = arith.constant 0 : index
    %89 = vector.load %arg6[%c1_51, %c0_52, %c0_53] : memref<2x32x32xf32, #tpu.memory_space<vmem>>, vector<1x32x32xf32>
    %90 = vector.shape_cast %89 : vector<1x32x32xf32> to vector<32x32xf32>
    %cst_54 = arith.constant dense<0.000000e+00> : vector<32x256xf32>
    %91 = tpu.matmul %90, %88, %cst_54 {dimension_numbers = #tpu.dot_dimension_numbers<[1], [0], [0], [1], [0, 0, 1, 1], [], []>} : vector<32x32xf32>, vector<32x256xf32>, vector<32x256xf32> -> vector<32x256xf32>
    %c1_55 = arith.constant 1 : index
    %c0_56 = arith.constant 0 : index
    %c0_57 = arith.constant 0 : index
    %92 = vector.load %arg12[%c1_55, %c0_56, %c0_57] : memref<3x32x256xf32, #tpu.memory_space<vmem>>, vector<1x32x256xf32>
    %93 = vector.shape_cast %92 : vector<1x32x256xf32> to vector<32x256xf32>
    %94 = arith.mulf %91, %93 : vector<32x256xf32>
    %c0_58 = arith.constant 0 : index
    %c0_59 = arith.constant 0 : index
    %c0_60 = arith.constant 0 : index
    %95 = vector.load %arg6[%c0_58, %c0_59, %c0_60] : memref<2x32x32xf32, #tpu.memory_space<vmem>>, vector<1x32x32xf32>
    %96 = vector.shape_cast %95 : vector<1x32x32xf32> to vector<32x32xf32>
    %cst_61 = arith.constant dense<0.000000e+00> : vector<32x256xf32>
    %97 = tpu.matmul %96, %94, %cst_61 {dimension_numbers = #tpu.dot_dimension_numbers<[1], [0], [0], [1], [0, 0, 1, 1], [], []>} : vector<32x32xf32>, vector<32x256xf32>, vector<32x256xf32> -> vector<32x256xf32>
    %c0_62 = arith.constant 0 : index
    %c0_63 = arith.constant 0 : index
    %c0_64 = arith.constant 0 : index
    %98 = vector.load %arg12[%c0_62, %c0_63, %c0_64] : memref<3x32x256xf32, #tpu.memory_space<vmem>>, vector<1x32x256xf32>
    %99 = vector.shape_cast %98 : vector<1x32x256xf32> to vector<32x256xf32>
    %100 = arith.mulf %97, %99 : vector<32x256xf32>
    %c0_65 = arith.constant 0 : index
    %c0_66 = arith.constant 0 : index
    %101 = vector.load %arg3[%c0_65, %c0_66] : memref<3x32xf32, #tpu.memory_space<vmem>>, vector<3x32xf32>
    %cst_67 = arith.constant dense<0.000000e+00> : vector<3x256xf32>
    %102 = tpu.matmul %101, %100, %cst_67 {dimension_numbers = #tpu.dot_dimension_numbers<[1], [0], [0], [1], [0, 0, 1, 1], [], []>} : vector<3x32xf32>, vector<32x256xf32>, vector<3x256xf32> -> vector<3x256xf32>
    %103 = vector.broadcast %82 : vector<1x256xf32> to vector<3x256xf32>
    %104 = arith.mulf %103, %102 : vector<3x256xf32>
    %105 = tpu.concatenate %104, %83 in 0 : vector<3x256xf32>, vector<1x256xf32> -> vector<4x256xf32>
    %c0_68 = arith.constant 0 : index
    %c0_69 = arith.constant 0 : index
    %106 = vector.load %arg11[%c0_68, %c0_69] : memref<4x256xf32, #tpu.memory_space<vmem>>, vector<4x256xf32>
    tpu.vector_store %arg11[%c0_68, %c0_69], %105 {strides = array<i32>} : memref<4x256xf32, #tpu.memory_space<vmem>>, vector<4x256xf32>,
    return
  }
  func.func @transform_0(%arg0: i32) -> (i32, i32) {
    %c0_i32 = arith.constant 0 : i32
    %c0_i32_0 = arith.constant 0 : i32
    return %c0_i32, %arg0 : i32, i32
  }
  func.func @transform_1(%arg0: i32) -> (i32, i32) {
    %c0_i32 = arith.constant 0 : i32
    %c0_i32_0 = arith.constant 0 : i32
    %c0_i32_1 = arith.constant 0 : i32
    return %c0_i32, %c0_i32_0 : i32, i32
  }
  func.func @transform_2(%arg0: i32) -> (i32, i32) {
    %c0_i32 = arith.constant 0 : i32
    %c0_i32_0 = arith.constant 0 : i32
    %c0_i32_1 = arith.constant 0 : i32
    return %c0_i32, %c0_i32_0 : i32, i32
  }
  func.func @transform_3(%arg0: i32) -> (i32, i32) {
    %c0_i32 = arith.constant 0 : i32
    %c0_i32_0 = arith.constant 0 : i32
    %c0_i32_1 = arith.constant 0 : i32
    return %c0_i32, %c0_i32_0 : i32, i32
  }
  func.func @transform_4(%arg0: i32) -> (i32, i32, i32) {
    %c0_i32 = arith.constant 0 : i32
    %c0_i32_0 = arith.constant 0 : i32
    %c0_i32_1 = arith.constant 0 : i32
    %c0_i32_2 = arith.constant 0 : i32
    return %c0_i32, %c0_i32_0, %c0_i32_1 : i32, i32, i32
  }
  func.func @transform_5(%arg0: i32) -> (i32, i32, i32) {
    %c0_i32 = arith.constant 0 : i32
    %c0_i32_0 = arith.constant 0 : i32
    %c0_i32_1 = arith.constant 0 : i32
    %c0_i32_2 = arith.constant 0 : i32
    return %c0_i32, %c0_i32_0, %c0_i32_1 : i32, i32, i32
  }
  func.func @transform_6(%arg0: i32) -> (i32, i32, i32) {
    %c0_i32 = arith.constant 0 : i32
    %c0_i32_0 = arith.constant 0 : i32
    %c0_i32_1 = arith.constant 0 : i32
    %c0_i32_2 = arith.constant 0 : i32
    return %c0_i32, %c0_i32_0, %c0_i32_1 : i32, i32, i32
  }
  func.func @transform_7(%arg0: i32) -> (i32, i32) {
    %c0_i32 = arith.constant 0 : i32
    %c0_i32_0 = arith.constant 0 : i32
    %c0_i32_1 = arith.constant 0 : i32
    return %c0_i32, %c0_i32_0 : i32, i32
  }
  func.func @transform_8(%arg0: i32) -> (i32, i32) {
    %c0_i32 = arith.constant 0 : i32
    %c0_i32_0 = arith.constant 0 : i32
    %c0_i32_1 = arith.constant 0 : i32
    return %c0_i32, %c0_i32_0 : i32, i32
  }
  func.func @transform_9(%arg0: i32) -> (i32, i32) {
    %c0_i32 = arith.constant 0 : i32
    %c0_i32_0 = arith.constant 0 : i32
    %c0_i32_1 = arith.constant 0 : i32
    return %c0_i32, %c0_i32_0 : i32, i32
  }
  func.func @transform_10(%arg0: i32) -> (i32, i32) {
    %c0_i32 = arith.constant 0 : i32
    %c0_i32_0 = arith.constant 0 : i32
    return %c0_i32, %arg0 : i32, i32
  }
}

</mosaic_0001>

<bundles_post_ra>
// kernel: jacvectornet_forward.1
= control target key start
LH: loop header
LB: loop body
LE: loop exit
PB: predicated region body
PF: predicated region fallthrough
CT: control target
= control target key end

     0   :  { %s2079_s13 = smov 0   ;;  %s2813_s0 = inlined_call_operand.vmem [shape: f32[3,512], index: 0, kind: input, shape index: {}]   ;;  %s2814_s1 = inlined_call_operand.vmem [shape: f32[32,3], index: 1, kind: input, shape index: {}]   ;;  %s2815_s2 = inlined_call_operand.vmem [shape: f32[3,32], index: 2, kind: input, shape index: {}]   ;;  %s2816_s3 = inlined_call_operand.vmem [shape: f32[32,1], index: 3, kind: input, shape index: {}]   ;;  %s2817_s4 = inlined_call_operand.vmem [shape: f32[2,32,32], index: 4, kind: input, shape index: {}]   ;;  %s2818_s5 = inlined_call_operand.vmem [shape: f32[2,32,32], index: 5, kind: input, shape index: {}]   ;;  %s2819_s6 = inlined_call_operand.vmem [shape: f32[2,32,1], index: 6, kind: input, shape index: {}]   ;;  %s2820_s7 = inlined_call_operand.vmem [shape: f32[2,32], index: 7, kind: input, shape index: {}]   ;;  %s2821_s8 = inlined_call_operand.vmem [shape: f32[2,1], index: 8, kind: input, shape index: {}]   ;;  %s2822_s9 = inlined_call_operand.vmem [shape: f32[32,1], index: 9, kind: input, shape index: {}]   ;;  %s2823_s10 = inlined_call_operand.vmem [shape: f32[4,512], index: 10, kind: output, shape index: {}]  }
   0x1 LB: > { %s1810_s14 = sadd.s32 4294967295, %s2020_s13   ;;  %p1814_p0 = scmp.ge.s32.totalorder %s2020_s13, 1  ;;  %s2020_s13 = sphi %s2079_s13, %s20_s13  }
   0x2   : > { %p313_p1 = scmp.lt.s32.totalorder %s2020_s13, 3 }
   0x4   : > { %p314_p2 = pnand %p1814_p0, %p313_p1 }
   0x6   : > { %317 = sbr.rel (%p314_p2) target bundleno = 1442 (0x5a2), region = 60 }
   0xb   : > { %s1815_s15 = sshll.u32 %s1810_s14, 1  ;;  %v2824_v0 = vmov 0.0   ;;  %v371_v1 = vld [vmem:[%s2816_s3 + $0x18] sm:$0xff]  ;;  %v2023_v2 = vmov 0   ;;  %v369_v3 = vld [vmem:[%s2816_s3 + $0x8] sm:$0xff]  ;;  %v370_v4 = vld [vmem:[%s2816_s3 + $0x10] sm:$0xff] }
   0xc   : > { %p352_p3 = scmp.lt.s32.totalorder %s1815_s15, 3  ;;  %476 = vmatprep.mubr.f32.mxu0 %v2824_v0  ;;  %782 = vmatprep.mubr.f32.mxu1 %v2824_v0  ;;  %v368_v5 = vld [vmem:[%s2816_s3] sm:$0xff]  ;;  %vm407_vm0 = vcmask 1042432   ;;  %v684_v8 = vld [vmem:[%s2819_s6 + $0x18] sm:$0xff]  ;;  %vm394_vm1 = vcmask 23552   ;;  %v683_v10 = vld [vmem:[%s2819_s6 + $0x10] sm:$0xff] }
   0xd   : > { %1867 = vset.pattern.permute.xlu0 %v2023_v2  ;;  %1868 = vset.pattern.permute.xlu1 %v2023_v2  ;;  %v364_v9 = vld [vmem:[%s2814_s1] sm:$0xff]  ;;  %v682_v11 = vld [vmem:[%s2819_s6 + $0x8] sm:$0xff]  ;;  %v1836_v14 = vld [vmem:[%s2819_s6 + $0x38] sm:$0xff] }
   0xe   : > { %s2891_s15 = smov (!%p352_p3, %s1815_s15), 3  ;;  %389 = vperm.xlu0 %1867, %v371_v1   ;;  %379 = vperm.xlu1 %1868, %v369_v3   ;;  %v365_v12 = vld [vmem:[%s2814_s1 + $0x8] sm:$0xff]  ;;  %v681_v13 = vld [vmem:[%s2819_s6] sm:$0xff]  ;;  %v366_v15 = vld [vmem:[%s2814_s1 + $0x10] sm:$0xff] }
   0xf   : > { %s1816_s24 = sshll.u32 %s2891_s15, 2  ;;  %v1835_v16 = vld [vmem:[%s2819_s6 + $0x30] sm:$0xff]  ;;  %v1834_v17 = vld [vmem:[%s2819_s6 + $0x28] sm:$0xff]  ;;  %v367_v18 = vld [vmem:[%s2814_s1 + $0x18] sm:$0xff] }
  0x10   : > { %s355_s27 = scalar_lea.vmem %s2813_s0, %s1816_s24  ;;  %v1833_v19 = vld [vmem:[%s2819_s6 + $0x20] sm:$0xff]  ;;  %v1376_v20 = vld [vmem:[%s2822_s9 + $0x18] sm:$0xff]  ;;  %v1375_v21 = vld [vmem:[%s2822_s9 + $0x10] sm:$0xff]  ;;  %s361_s12 = scalar_lea.vmem %s2823_s10, %s1816_s24 }
  0x11   : > { %v363_v6 = vld [vmem:[%s355_s27] sm:$0x77]  ;;  %v1374_v22 = vld [vmem:[%s2822_s9 + $0x8] sm:$0xff] }
  0x12   : > { %384 = vperm.xlu0 %1867, %v370_v4   ;;  %374 = vperm.xlu1 %1868, %v368_v5   ;;  %v393_v7 = vcombine.high %v363_v6, %v363_v6  ;;  %v1373_v23 = vld [vmem:[%s2822_s9] sm:$0xff] }
  0x13   : > { %v1293_v24 = vld [vmem:[%s2821_s8] sm:$0x3] }
  0x14   : > { %1819 = vmatprep.subr.msk.mxu0 %vm407_vm0, %v393_v7 }
  0x15   : > { %1820 = vmatpush1.msk.msra.mxu0 %vm407_vm0, %v363_v6 }
  0x16   : > { %702 = vperm.xlu0 %1867, %v684_v8   ;;  %1821 = vmatmul.mubr.msk.f32.vlgmr.msra.gmra.mxu0 %vm394_vm1, %v364_v9 }
  0x17   : > { %697 = vperm.xlu1 %1868, %v683_v10   ;;  %482 = vmatprep.mubr.f32.mxu0 %v2824_v0 }
  0x1a   : > { %692 = vperm.xlu0 %1867, %v682_v11   ;;  %1822 = vmatmul.mubr.msk.f32.gmra.mxu0 %vm394_vm1, %v365_v12 }
  0x1b   : > { %687 = vperm.xlu1 %1868, %v681_v13   ;;  %488 = vmatprep.mubr.f32.mxu0 %v2824_v0 }
  0x1e   : > { %1011 = vperm.xlu0 %1867, %v1836_v14   ;;  %1823 = vmatmul.mubr.msk.f32.gmra.mxu0 %vm394_vm1, %v366_v15 }
  0x1f   : > { %1006 = vperm.xlu1 %1868, %v1835_v16   ;;  %494 = vmatprep.mubr.f32.mxu0 %v2824_v0 }
  0x22   : > { %1001 = vperm.xlu0 %1867, %v1834_v17   ;;  %1824 = vmatmul.mubr.msk.f32.gmra.mxu0 %vm394_vm1, %v367_v18 }
  0x23   : > { %996 = vperm.xlu1 %1868, %v1833_v19   ;;  %1090 = vmatprep.mubr.f32.mxu0 %v2824_v0 }
  0x26   : > { %1402 = vperm.xlu0 %1867, %v1376_v20  }
  0x27   : > { %1397 = vperm.xlu1 %1868, %v1375_v21  }
  0x2a   : > { %1392 = vperm.xlu0 %1867, %v1374_v22  }
  0x2b   : > { %1387 = vperm.xlu1 %1868, %v1373_v23  }
  0x2e   : > { %1296 = vperm.xlu0 %1867, %v1293_v24  }
  0x89   : > { %v380_v25 = vpop.permute.xlu1 %379  ;;  %v390_v29 = vpop.permute.xlu0 %389 }
  0x8d   : > { %v375_v26 = vpop.permute.xlu1 %374  ;;  %v385_v41 = vpop.permute.xlu0 %384 }
  0xd6   : > { %v478_v27 = vpop.f32.mrf.mxu0 }
  0xd7   : > { %v2170_v28 = vadd.f32 %v478_v27, %v375_v26 }
  0xd8   : > { %v480_v30 = vpop.f32.mrf.mxu0 }
  0xd9   : > { %v501_v31 = vand.u32 2147483647, %v2170_v28  ;;  %v2173_v32 = vadd.f32 %v480_v30, %v375_v26  ;;  %vm557_vm2 = vcmp.ge.f32.partialorder %v2170_v28, 0.0 }
  0xda   : > { %v484_v33 = vpop.f32.mrf.mxu0 }
  0xdb   : > { %v509_v34 = vsub.f32 0.0, %v501_v31  ;;  %v502_v35 = vand.u32 2147483647, %v2173_v32  ;;  %v2176_v36 = vadd.f32 %v484_v33, %v380_v25  ;;  %vm558_vm3 = vcmp.ge.f32.partialorder %v2173_v32, 0.0 }
  0xdc   : > { %v486_v37 = vpop.f32.mrf.mxu0 }
  0xdd   : > { %v517_v38 = vmul.f32 1.442695, %v509_v34  ;;  %v510_v39 = vsub.f32 0.0, %v502_v35  ;;  %v503_v40 = vand.u32 2147483647, %v2176_v36  ;;  %v2179_v42 = vadd.f32 %v486_v37, %v380_v25 }
  0xde   : > { %v490_v43 = vpop.f32.mrf.mxu0  ;;  %vm559_vm4 = vcmp.ge.f32.partialorder %v2176_v36, 0.0 }
  0xdf   : > { %1870 = vpow2.f32 %v517_v38  ;;  %v519_v44 = vmul.f32 1.442695, %v510_v39  ;;  %v511_v45 = vsub.f32 0.0, %v503_v40  ;;  %v2181_v46 = vadd.f32 %v490_v43, %v385_v41 }
  0xe0   : > { %v504_v47 = vand.u32 2147483647, %v2179_v42  ;;  %v492_v48 = vpop.f32.mrf.mxu0  ;;  %v584_v23 = vmax.f32 %v2179_v42, 0.0  ;;  %vm560_vm5 = vcmp.ge.f32.partialorder %v2179_v42, 0.0  ;;  %v680_v42 = vld [vmem:[%s2817_s4 + $0x18] sm:$0xff] }
  0xe1   : > { %1872 = vpow2.f32 %v519_v44  ;;  %v521_v49 = vmul.f32 1.442695, %v511_v45  ;;  %v505_v50 = vand.u32 2147483647, %v2181_v46  ;;  %v2185_v52 = vadd.f32 %v492_v48, %v385_v41 }
  0xe2   : > { %v512_v51 = vsub.f32 0.0, %v504_v47  ;;  %v496_v53 = vpop.f32.mrf.mxu0  ;;  %v585_v26 = vmax.f32 %v2181_v46, 0.0  ;;  %vm561_vm6 = vcmp.ge.f32.partialorder %v2181_v46, 0.0 }
  0xe3   : > { %1874 = vpow2.f32 %v521_v49  ;;  %v513_v54 = vsub.f32 0.0, %v505_v50  ;;  %v2187_v55 = vadd.f32 %v496_v53, %v390_v29  ;;  %v506_v57 = vand.u32 2147483647, %v2185_v52 }
  0xe4   : > { %v523_v56 = vmul.f32 1.442695, %v512_v51  ;;  %v498_v58 = vpop.f32.mrf.mxu0  ;;  %v586_v34 = vmax.f32 %v2185_v52, 0.0  ;;  %vm562_vm7 = vcmp.ge.f32.partialorder %v2185_v52, 0.0  ;;  %v582_v52 = vmax.f32 %v2173_v32, 0.0  ;;  %v679_v32 = vld [vmem:[%s2817_s4 + $0x10] sm:$0xff] }
  0xe5   : > { %v525_v59 = vmul.f32 1.442695, %v513_v54  ;;  %v507_v60 = vand.u32 2147483647, %v2187_v55  ;;  %v2191_v61 = vadd.f32 %v498_v58, %v390_v29  ;;  %v514_v62 = vsub.f32 0.0, %v506_v57 }
  0xe6   : > { %1876 = vpow2.f32 %v523_v56  ;;  %v587_v35 = vmax.f32 %v2187_v55, 0.0  ;;  %vm563_vm8 = vcmp.ge.f32.partialorder %v2187_v55, 0.0 }
  0xe7   : > { %1878 = vpow2.f32 %v525_v59  ;;  %v515_v63 = vsub.f32 0.0, %v507_v60  ;;  %v508_v1 = vand.u32 2147483647, %v2191_v61  ;;  %v527_v2 = vmul.f32 1.442695, %v514_v62 }
  0xe8   : > { %v588_v38 = vmax.f32 %v2191_v61, 0.0  ;;  %vm564_vm9 = vcmp.ge.f32.partialorder %v2191_v61, 0.0 }
  0xe9   : > { %v529_v3 = vmul.f32 1.442695, %v515_v63  ;;  %v516_v4 = vsub.f32 0.0, %v508_v1  ;;  %1880 = vpow2.f32 %v527_v2 }
  0xeb   : > { %1882 = vpow2.f32 %v529_v3  ;;  %v531_v5 = vmul.f32 1.442695, %v516_v4 }
  0xec   : > { %v2194_v6 = vpop.eup %1870 }
  0xed   : > { %1884 = vpow2.f32 %v531_v5  ;;  %v533_v7 = vadd.f32 1.0, %v2194_v6  ;;  %v592_v27 = vmul.f32 -0.5, %v2194_v6  ;;  %v595_v48 = vand.u32 2147483647, %v2194_v6 }
  0xee   : > { %v2197_v8 = vpop.eup %1872 }
  0xef   : > { %v534_v9 = vadd.f32 1.0, %v2197_v8  ;;  %1886 = vrcp.f32 %v533_v7  ;;  %v601_v44 = vmul.f32 -0.5, %v2197_v8  ;;  %v604_v45 = vand.u32 2147483647, %v2197_v8 }
  0xf0   : > { %v2200_v10 = vpop.eup %1874  ;;  %v2247_v47 = vadd.f32 1.0, %v592_v27 }
  0xf1   : > { %v535_v11 = vadd.f32 1.0, %v2200_v10  ;;  %1888 = vrcp.f32 %v534_v9  ;;  %v610_v29 = vmul.f32 -0.5, %v2200_v10  ;;  %v613_v59 = vand.u32 2147483647, %v2200_v10 }
  0xf2   : > { %vm605_vm1 = vcmp.lt.f32.partialorder %v604_v45, 0.0004427343  ;;  %v594_v55 = vmul.f32 %v2194_v6, %v2247_v47  ;;  %v581_v45 = vmax.f32 %v2170_v28, 0.0  ;;  %v678_v28 = vld [vmem:[%s2817_s4 + $0x8] sm:$0xff] }
  0xf3   : > { %v2203_v12 = vpop.eup %1876  ;;  %1890 = vrcp.f32 %v535_v11  ;;  %v611_v53 = vadd.f32 1.0, %v610_v29  ;;  %vm2327_vm15 = vcmp.lt.f32.partialorder %v613_v59, 0.0004427343 }
  0xf4   : > { %v2205_v13 = vpop.eup %1878  ;;  %v536_v14 = vadd.f32 1.0, %v2203_v12  ;;  %1892 = vlog2.f32 %v533_v7  ;;  %v619_v51 = vmul.f32 -0.5, %v2203_v12  ;;  %v622_v2 = vand.u32 2147483647, %v2203_v12 }
  0xf5   : > { %v537_v15 = vadd.f32 1.0, %v2205_v13  ;;  %1894 = vlog2.f32 %v534_v9  ;;  %v628_v39 = vmul.f32 -0.5, %v2205_v13  ;;  %v631_v1 = vand.u32 2147483647, %v2205_v13 }
  0xf6   : > { %1896 = vrcp.f32 %v536_v14  ;;  %v2209_v16 = vpop.eup %1880  ;;  %v602_v9 = vadd.f32 1.0, %v601_v44  ;;  %vm2283_vm11 = vcmp.lt.f32.partialorder %v622_v2, 0.0004427343 }
  0xf7   : > { %1898 = vrcp.f32 %v537_v15  ;;  %v538_v18 = vadd.f32 1.0, %v2209_v16  ;;  %v637_v58 = vmul.f32 -0.5, %v2209_v16  ;;  %v629_v63 = vadd.f32 1.0, %v628_v39 }
  0xf8   : > { %v2211_v17 = vpop.eup %1882  ;;  %1900 = vlog2.f32 %v535_v11  ;;  %v640_v7 = vand.u32 2147483647, %v2209_v16  ;;  %vm2279_vm10 = vcmp.lt.f32.partialorder %v631_v1, 0.0004427343  ;;  %v603_v61 = vmul.f32 %v2197_v8, %v602_v9 }
  0xf9   : > { %v539_v19 = vadd.f32 1.0, %v2211_v17  ;;  %1902 = vlog2.f32 %v537_v15  ;;  %v646_v50 = vmul.f32 -0.5, %v2211_v17  ;;  %v649_v5 = vand.u32 2147483647, %v2211_v17 }
  0xfa   : > { %v2215_v20 = vpop.eup %1884  ;;  %1904 = vrcp.f32 %v538_v18  ;;  %v638_v27 = vadd.f32 1.0, %v637_v58  ;;  %vm2292_vm13 = vcmp.lt.f32.partialorder %v640_v7, 0.0004427343 }
  0xfb   : > { %v540_v21 = vadd.f32 1.0, %v2215_v20  ;;  %1906 = vrcp.f32 %v539_v19  ;;  %v655_v57 = vmul.f32 -0.5, %v2215_v20  ;;  %v647_v15 = vadd.f32 1.0, %v646_v50 }
  0xfc   : > { %v1887_v22 = vpop.eup %1886  ;;  %1908 = vlog2.f32 %v539_v19  ;;  %v612_v19 = vmul.f32 %v2200_v10, %v611_v53  ;;  %vm2288_vm12 = vcmp.lt.f32.partialorder %v649_v5, 0.0004427343 }
  0xfd   : > { %1910 = vrcp.f32 %v540_v21  ;;  %v565_v24 = vmul.f32 %v1887_v22, %v2194_v6  ;;  %v677_v6 = vld [vmem:[%s2817_s4] sm:$0xff] }
  0xfe   : > { %v1889_v25 = vpop.eup %1888  ;;  %1912 = vlog2.f32 %v540_v21 }
  0xff   : > { %1914 = vlog2.f32 %v538_v18  ;;  %v2227_v30 = vsel %vm557_vm2, %v1887_v22, %v565_v24  ;;  %v566_v31 = vmul.f32 %v1889_v25, %v2197_v8  ;;  %v620_v18 = vadd.f32 1.0, %v619_v51 }
 0x100   : > { %2826 = vst [vmem:[#allocation3_spill] sm:$0xff] %v2227_v30  ;;  %v1891_v33 = vpop.eup %1890  ;;  %1916 = vlog2.f32 %v536_v14  ;;  %v656_v24 = vadd.f32 1.0, %v655_v57  ;;  %vm596_vm2 = vcmp.lt.f32.partialorder %v595_v48, 0.0004427343 }
 0x101   : > { %v2233_v37 = vpop.eup %1892  ;;  %v2239_v40 = vsel %vm558_vm3, %v1889_v25, %v566_v31  ;;  %v567_v41 = vmul.f32 %v1891_v33, %v2200_v10  ;;  %v658_v25 = vand.u32 2147483647, %v2215_v20  ;;  %vm705_vm3 = vcmask 261120  }
 0x102   : > { %2827 = vst [vmem:[#allocation4_spill] sm:$0xff] %v2239_v40  ;;  %v2243_v43 = vpop.eup %1894  ;;  %v657_v2 = vmul.f32 %v2215_v20, %v656_v24 }
 0x103   : > { %v1897_v49 = vpop.eup %1896  ;;  %v2255_v54 = vsel %vm559_vm4, %v1891_v33, %v567_v41  ;;  %v630_v33 = vmul.f32 %v2205_v13, %v629_v63  ;;  %vm659_vm14 = vcmp.lt.f32.partialorder %v658_v25, 0.0004427343 }
 0x104   : > { %2828 = vst [vmem:[#allocation5_spill] sm:$0xff] %v2255_v54  ;;  %v1899_v56 = vpop.eup %1898  ;;  %v568_v60 = vmul.f32 %v1897_v49, %v2203_v12 }
 0x105   : > { %v1901_v62 = vpop.eup %1900  ;;  %v569_v3 = vmul.f32 %v1899_v56, %v2205_v13 }
 0x106   : > { %v1903_v4 = vpop.eup %1902  ;;  %v2269_v11 = vsel %vm560_vm5, %v1897_v49, %v568_v60 }
 0x107   : > { %2829 = vst [vmem:[#allocation6_spill] sm:$0xff] %v2269_v11  ;;  %v1905_v14 = vpop.eup %1904  ;;  %v2274_v21 = vsel %vm561_vm6, %v1899_v56, %v569_v3  ;;  %v648_v56 = vmul.f32 %v2211_v17, %v647_v15  ;;  %v627_v57 = vmul.f32 0.6931472, %v1903_v4  ;;  %v639_v3 = vmul.f32 %v2209_v16, %v638_v27 }
 0x108   : > { %2830 = vst [vmem:[#allocation7_spill] sm:$0xff] %v2274_v21  ;;  %v1907_v22 = vpop.eup %1906  ;;  %v570_v29 = vmul.f32 %v1905_v14, %v2209_v16 }
 0x109   : > { %v1909_v31 = vpop.eup %1908  ;;  %v571_v41 = vmul.f32 %v1907_v22, %v2211_v17  ;;  %v609_v17 = vmul.f32 0.6931472, %v1901_v62  ;;  %v633_v24 = vsel %vm2279_vm10, %v630_v33, %v627_v57  ;;  %v591_v62 = vmul.f32 0.6931472, %v2233_v37 }
 0x10a   : > { %v1911_v44 = vpop.eup %1910  ;;  %v645_v49 = vmul.f32 0.6931472, %v1909_v31  ;;  %v2298_v13 = vsel %vm562_vm7, %v1905_v14, %v570_v29  ;;  %v621_v29 = vmul.f32 %v2203_v12, %v620_v18  ;;  %v600_v31 = vmul.f32 0.6931472, %v2243_v43 }
 0x10b   : > { %2839 = vst [vmem:[#allocation8_spill] sm:$0xff] %v2298_v13  ;;  %v1913_v53 = vpop.eup %1912  ;;  %v2303_v58 = vsel %vm563_vm8, %v1907_v22, %v571_v41  ;;  %v572_v60 = vmul.f32 %v1911_v44, %v2215_v20  ;;  %v615_v43 = vsel %vm2327_vm15, %v612_v19, %v609_v17  ;;  %v665_v37 = vadd.f32 %v633_v24, %v585_v26  ;;  %v703_v26 = vpop.permute.xlu0 %702 }
 0x10c   : > { %2840 = vst [vmem:[#allocation9_spill] sm:$0xff] %v2303_v58  ;;  %v1915_v63 = vpop.eup %1914  ;;  %v654_v1 = vmul.f32 0.6931472, %v1913_v53  ;;  %v651_v7 = vsel %vm2288_vm12, %v648_v56, %v645_v49  ;;  %v606_v59 = vsel %vm605_vm1, %v603_v61, %v600_v31 }
 0x10d   : > { %v1917_v5 = vpop.eup %1916  ;;  %v636_v14 = vmul.f32 0.6931472, %v1915_v63  ;;  %v2312_v4 = vsel %vm564_vm9, %v1911_v44, %v572_v60  ;;  %v667_v25 = vadd.f32 %v651_v7, %v587_v35  ;;  %v583_v35 = vmax.f32 %v2176_v36, 0.0 }
 0x10e   : > { %v660_v15 = vsel %vm659_vm14, %v657_v2, %v654_v1  ;;  %v618_v22 = vmul.f32 0.6931472, %v1917_v5  ;;  %v662_v36 = vadd.f32 %v606_v59, %v582_v52 }
 0x10f   : > { %v668_v20 = vadd.f32 %v660_v15, %v588_v38  ;;  %v642_v16 = vsel %vm2292_vm13, %v639_v3, %v636_v14  ;;  %v663_v47 = vadd.f32 %v615_v43, %v583_v35  ;;  %v693_v10 = vpop.permute.xlu0 %692 }
 0x110   : > { %v624_v27 = vsel %vm2283_vm11, %v621_v29, %v618_v22  ;;  %v666_v38 = vadd.f32 %v642_v16, %v586_v34  ;;  %v597_v34 = vsel %vm596_vm2, %v594_v55, %v591_v62 }
 0x111   : > { %742 = vmatprep.subr.mxu1 %v668_v20  ;;  %v664_v8 = vadd.f32 %v624_v27, %v584_v23  ;;  %v661_v46 = vadd.f32 %v597_v34, %v581_v45  ;;  %v698_v23 = vpop.permute.xlu1 %697 }
 0x112   : > { %743 = vmatpush1.msra.mxu1 %v667_v25 }
 0x113   : > { %744 = vmatprep.subr.mxu1 %v666_v38 }
 0x114   : > { %745 = vmatpush1.msra.mxu1 %v665_v37 }
 0x115   : > { %746 = vmatprep.subr.mxu1 %v664_v8  ;;  %v688_v48 = vpop.permute.xlu1 %687 }
 0x116   : > { %747 = vmatpush1.msra.mxu1 %v663_v47 }
 0x117   : > { %748 = vmatprep.subr.mxu1 %v662_v36 }
 0x118   : > { %749 = vmatpush1.msra.mxu1 %v661_v46 }
 0x119   : > { %1825 = vmatmul.mubr.msk.f32.vlgmr.msra.gmra.mxu1 %vm705_vm3, %v677_v6 }
 0x11a   : > { %788 = vmatprep.mubr.f32.mxu1 %v2824_v0 }
 0x11d   : > { %1826 = vmatmul.mubr.msk.f32.gmra.mxu1 %vm705_vm3, %v678_v28 }
 0x11e   : > { %794 = vmatprep.mubr.f32.mxu1 %v2824_v0 }
 0x121   : > { %1827 = vmatmul.mubr.msk.f32.gmra.mxu1 %vm705_vm3, %v679_v32 }
 0x122   : > { %800 = vmatprep.mubr.f32.mxu1 %v2824_v0 }
 0x125   : > { %1828 = vmatmul.mubr.msk.f32.gmra.mxu1 %vm705_vm3, %v680_v42 }
 0x126   : > { %1366 = vmatprep.mubr.f32.mxu1 %v2824_v0 }
 0x1d9   : > { %v784_v9 = vpop.f32.mrf.mxu1 }
 0x1da   : > { %v2369_v18 = vadd.f32 %v784_v9, %v688_v48 }
 0x1db   : > { %v786_v19 = vpop.f32.mrf.mxu1 }
 0x1dc   : > { %v807_v33 = vand.u32 2147483647, %v2369_v18  ;;  %v2372_v39 = vadd.f32 %v786_v19, %v688_v48  ;;  %vm863_vm4 = vcmp.ge.f32.partialorder %v2369_v18, 0.0 }
 0x1dd   : > { %v790_v41 = vpop.f32.mrf.mxu1 }
 0x1de   : > { %v815_v44 = vsub.f32 0.0, %v807_v33  ;;  %v808_v49 = vand.u32 2147483647, %v2372_v39  ;;  %v2375_v50 = vadd.f32 %v790_v41, %v693_v10  ;;  %vm864_vm5 = vcmp.ge.f32.partialorder %v2372_v39, 0.0 }
 0x1df   : > { %v792_v51 = vpop.f32.mrf.mxu1 }
 0x1e0   : > { %v823_v53 = vmul.f32 1.442695, %v815_v44  ;;  %v816_v56 = vsub.f32 0.0, %v808_v49  ;;  %v809_v57 = vand.u32 2147483647, %v2375_v50  ;;  %v2378_v60 = vadd.f32 %v792_v51, %v693_v10 }
 0x1e1   : > { %v796_v63 = vpop.f32.mrf.mxu1  ;;  %vm865_vm9 = vcmp.ge.f32.partialorder %v2375_v50, 0.0 }
 0x1e2   : > { %1918 = vpow2.f32 %v823_v53  ;;  %v825_v1 = vmul.f32 1.442695, %v816_v56  ;;  %v817_v2 = vsub.f32 0.0, %v809_v57  ;;  %v2380_v3 = vadd.f32 %v796_v63, %v698_v23 }
 0x1e3   : > { %v810_v5 = vand.u32 2147483647, %v2378_v60  ;;  %v798_v7 = vpop.f32.mrf.mxu1  ;;  %vm866_vm6 = vcmp.ge.f32.partialorder %v2378_v60, 0.0 }
 0x1e4   : > { %1920 = vpow2.f32 %v825_v1  ;;  %v827_v14 = vmul.f32 1.442695, %v817_v2  ;;  %v811_v17 = vand.u32 2147483647, %v2380_v3  ;;  %v2384_v22 = vadd.f32 %v798_v7, %v698_v23 }
 0x1e5   : > { %v818_v15 = vsub.f32 0.0, %v810_v5  ;;  %v802_v29 = vpop.f32.mrf.mxu1  ;;  %vm867_vm12 = vcmp.ge.f32.partialorder %v2380_v3, 0.0 }
 0x1e6   : > { %1922 = vpow2.f32 %v827_v14  ;;  %v819_v31 = vsub.f32 0.0, %v811_v17  ;;  %v2386_v20 = vadd.f32 %v802_v29, %v703_v26  ;;  %v812_v24 = vand.u32 2147483647, %v2384_v22 }
 0x1e7   : > { %v829_v16 = vmul.f32 1.442695, %v818_v15  ;;  %v804_v62 = vpop.f32.mrf.mxu1  ;;  %vm868_vm7 = vcmp.ge.f32.partialorder %v2384_v22, 0.0 }
 0x1e8   : > { %v831_v25 = vmul.f32 1.442695, %v819_v31  ;;  %v813_v27 = vand.u32 2147483647, %v2386_v20  ;;  %v2390_v12 = vadd.f32 %v804_v62, %v703_v26  ;;  %v820_v61 = vsub.f32 0.0, %v812_v24 }
 0x1e9   : > { %1924 = vpow2.f32 %v829_v16  ;;  %vm869_vm15 = vcmp.ge.f32.partialorder %v2386_v20, 0.0 }
 0x1ea   : > { %1926 = vpow2.f32 %v831_v25  ;;  %v821_v38 = vsub.f32 0.0, %v813_v27  ;;  %v814_v43 = vand.u32 2147483647, %v2390_v12  ;;  %v833_v55 = vmul.f32 1.442695, %v820_v61 }
 0x1eb   : > { %v894_v1 = vmax.f32 %v2390_v12, 0.0  ;;  %vm870_vm8 = vcmp.ge.f32.partialorder %v2390_v12, 0.0 }
 0x1ec   : > { %v835_v35 = vmul.f32 1.442695, %v821_v38  ;;  %v822_v37 = vsub.f32 0.0, %v814_v43  ;;  %1928 = vpow2.f32 %v833_v55 }
 0x1ee   : > { %1930 = vpow2.f32 %v835_v35  ;;  %v837_v59 = vmul.f32 1.442695, %v822_v37 }
 0x1ef   : > { %v2393_v52 = vpop.eup %1918 }
 0x1f0   : > { %v839_v8 = vadd.f32 1.0, %v2393_v52  ;;  %1932 = vpow2.f32 %v837_v59  ;;  %v898_v10 = vmul.f32 -0.5, %v2393_v52  ;;  %v2856_v41 = vand.u32 2147483647, %v2393_v52 }
 0x1f1   : > { %v2396_v34 = vpop.eup %1920 }
 0x1f2   : > { %v840_v45 = vadd.f32 1.0, %v2396_v34  ;;  %1934 = vrcp.f32 %v839_v8  ;;  %v899_v14 = vadd.f32 1.0, %v898_v10  ;;  %v907_v16 = vmul.f32 -0.5, %v2396_v34 }
 0x1f3   : > { %v2399_v47 = vpop.eup %1922 }
 0x1f4   : > { %v841_v36 = vadd.f32 1.0, %v2399_v47  ;;  %1936 = vrcp.f32 %v840_v45  ;;  %v916_v53 = vmul.f32 -0.5, %v2399_v47  ;;  %v919_v55 = vand.u32 2147483647, %v2399_v47 }
 0x1f5   : > { %1938 = vlog2.f32 %v839_v8 }
 0x1f6   : > { %v2402_v46 = vpop.eup %1924  ;;  %1940 = vlog2.f32 %v841_v36  ;;  %v917_v25 = vadd.f32 1.0, %v916_v53  ;;  %vm2467_vm10 = vcmp.lt.f32.partialorder %v919_v55, 0.0004427343  ;;  %v1012_v55 = vpop.permute.xlu0 %1011 }
 0x1f7   : > { %v2404_v6 = vpop.eup %1926  ;;  %v842_v28 = vadd.f32 1.0, %v2402_v46  ;;  %v925_v31 = vmul.f32 -0.5, %v2402_v46  ;;  %v928_v37 = vand.u32 2147483647, %v2402_v46 }
 0x1f8   : > { %v843_v32 = vadd.f32 1.0, %v2404_v6  ;;  %v934_v15 = vmul.f32 -0.5, %v2404_v6 }
 0x1f9   : > { %1942 = vrcp.f32 %v842_v28  ;;  %v2408_v42 = vpop.eup %1928  ;;  %vm2472_vm11 = vcmp.lt.f32.partialorder %v928_v37, 0.0004427343 }
 0x1fa   : > { %1944 = vlog2.f32 %v840_v45  ;;  %v844_v26 = vadd.f32 1.0, %v2408_v42  ;;  %v943_v61 = vmul.f32 -0.5, %v2408_v42  ;;  %v935_v45 = vadd.f32 1.0, %v934_v15 }
 0x1fb   : > { %v2410_v23 = vpop.eup %1930  ;;  %1946 = vlog2.f32 %v843_v32 }
 0x1fc   : > { %v845_v48 = vadd.f32 1.0, %v2410_v23  ;;  %1948 = vlog2.f32 %v842_v28  ;;  %v952_v27 = vmul.f32 -0.5, %v2410_v23  ;;  %v946_v28 = vand.u32 2147483647, %v2408_v42 }
 0x1fd   : > { %v2414_v9 = vpop.eup %1932  ;;  %1950 = vrcp.f32 %v844_v26  ;;  %v944_v53 = vadd.f32 1.0, %v943_v61 }
 0x1fe   : > { %1952 = vlog2.f32 %v845_v48  ;;  %v846_v19 = vadd.f32 1.0, %v2414_v9  ;;  %v961_v35 = vmul.f32 -0.5, %v2414_v9  ;;  %vm2483_vm14 = vcmp.lt.f32.partialorder %v946_v28, 0.0004427343 }
 0x1ff   : > { %1954 = vlog2.f32 %v844_v26  ;;  %v1935_v33 = vpop.eup %1934  ;;  %v2456_v26 = vmul.f32 %v2393_v52, %v899_v14  ;;  %v945_v56 = vmul.f32 %v2408_v42, %v944_v53 }
 0x200   : > { %1956 = vrcp.f32 %v846_v19  ;;  %v871_v49 = vmul.f32 %v1935_v33, %v2393_v52  ;;  %v962_v0 = vadd.f32 1.0, %v961_v35  ;;  %v887_v52 = vmax.f32 %v2369_v18, 0.0  ;;  %v1830_v18 = vld [vmem:[%s2817_s4 + $0x28] sm:$0xff] }
 0x201   : > { %1958 = vlog2.f32 %v846_v19  ;;  %v1937_v51 = vpop.eup %1936  ;;  %v926_v19 = vadd.f32 1.0, %v925_v31  ;;  %v964_v31 = vand.u32 2147483647, %v2414_v9 }
 0x202   : > { %1960 = vrcp.f32 %v841_v36  ;;  %v2431_v2 = vsel %vm863_vm4, %v1935_v33, %v871_v49  ;;  %v872_v5 = vmul.f32 %v1937_v51, %v2396_v34  ;;  %v2434_v7 = vpop.eup %1938  ;;  %v937_v36 = vand.u32 2147483647, %v2404_v6 }
 0x203   : > { %1962 = vrcp.f32 %v843_v32  ;;  %v1941_v29 = vpop.eup %1940  ;;  %v2465_v49 = vmul.f32 %v2399_v47, %v917_v25  ;;  %v927_v44 = vmul.f32 %v2402_v46, %v926_v19  ;;  %v963_v57 = vmul.f32 %v2414_v9, %v962_v0 }
 0x204   : > { %v2443_v24 = vsel %vm864_vm5, %v1937_v51, %v872_v5  ;;  %1964 = vrcp.f32 %v845_v48  ;;  %v955_v48 = vand.u32 2147483647, %v2410_v23  ;;  %v953_v51 = vadd.f32 1.0, %v952_v27 }
 0x205   : > { %v908_v5 = vadd.f32 1.0, %v907_v16  ;;  %v936_v27 = vmul.f32 %v2404_v6, %v935_v45  ;;  %vm2479_vm13 = vcmp.lt.f32.partialorder %v937_v36, 0.0004427343  ;;  %vm965_vm2 = vcmp.lt.f32.partialorder %v964_v31, 0.0004427343 }
 0x206   : > { %v1943_v62 = vpop.eup %1942  ;;  %vm2488_vm1 = vcmp.lt.f32.partialorder %v955_v48, 0.0004427343  ;;  %v954_v28 = vmul.f32 %v2410_v23, %v953_v51  ;;  %v915_v63 = vmul.f32 0.6931472, %v1941_v29  ;;  %vm902_vm5 = vcmp.lt.f32.partialorder %v2856_v41, 0.0004427343 }
 0x207   : > { %v1945_v43 = vpop.eup %1944  ;;  %v874_v59 = vmul.f32 %v1943_v62, %v2402_v46 }
 0x208   : > { %v1947_v8 = vpop.eup %1946  ;;  %v906_v0 = vmul.f32 0.6931472, %v1945_v43  ;;  %v909_v43 = vmul.f32 %v2396_v34, %v908_v5  ;;  %v921_v12 = vsel %vm2467_vm10, %v2465_v49, %v915_v63  ;;  %v2858_v49 = vmax.f32 %v2378_v60, 0.0  ;;  %v1832_v60 = vld [vmem:[%s2817_s4 + $0x38] sm:$0xff] }
 0x209   : > { %v1949_v32 = vpop.eup %1948  ;;  %v2462_v33 = vsel %vm866_vm6, %v1943_v62, %v874_v59 }
 0x20a   : > { %v1951_v10 = vpop.eup %1950 }
 0x20b   : > { %v1953_v15 = vpop.eup %1952  ;;  %v876_v62 = vmul.f32 %v1951_v10, %v2408_v42  ;;  %v897_v42 = vmul.f32 0.6931472, %v2434_v7  ;;  %v2853_v7 = vmax.f32 %v2386_v20, 0.0  ;;  %v1829_v20 = vld [vmem:[%s2817_s4 + $0x20] sm:$0xff] }
 0x20c   : > { %v1955_v25 = vpop.eup %1954  ;;  %v951_v61 = vmul.f32 0.6931472, %v1953_v15  ;;  %v933_v15 = vmul.f32 0.6931472, %v1947_v8 }
 0x20d   : > { %v1957_v35 = vpop.eup %1956  ;;  %v942_v59 = vmul.f32 0.6931472, %v1955_v25  ;;  %v2495_v45 = vsel %vm868_vm7, %v1951_v10, %v876_v62  ;;  %v924_v25 = vmul.f32 0.6931472, %v1949_v32 }
 0x20e   : > { %v1959_v36 = vpop.eup %1958  ;;  %v878_v17 = vmul.f32 %v1957_v35, %v2414_v9  ;;  %v957_v46 = vsel %vm2488_vm1, %v954_v28, %v951_v61  ;;  %v939_v29 = vsel %vm2479_vm13, %v936_v27, %v933_v15  ;;  %v2859_v27 = vmax.f32 %v2375_v50, 0.0  ;;  %v1831_v50 = vld [vmem:[%s2817_s4 + $0x30] sm:$0xff] }
 0x20f   : > { %v1961_v38 = vpop.eup %1960  ;;  %v960_v48 = vmul.f32 0.6931472, %v1959_v36  ;;  %v948_v53 = vsel %vm2483_vm14, %v945_v56, %v942_v59  ;;  %v930_v56 = vsel %vm2472_vm11, %v927_v44, %v924_v25  ;;  %v1002_v25 = vpop.permute.xlu0 %1001 }
 0x210   : > { %v873_v19 = vmul.f32 %v1961_v38, %v2399_v47  ;;  %v2506_v8 = vsel %vm870_vm8, %v1957_v35, %v878_v17  ;;  %v1963_v10 = vpop.eup %1962  ;;  %v970_v14 = vadd.f32 %v930_v56, %v2858_v49 }
 0x211   : > { %v966_v51 = vsel %vm965_vm2, %v963_v57, %v960_v48  ;;  %v1965_v9 = vpop.eup %1964  ;;  %v875_v17 = vmul.f32 %v1963_v10, %v2404_v6  ;;  %v973_v57 = vadd.f32 %v957_v46, %v2853_v7  ;;  %v2855_v6 = vand.u32 2147483647, %v2396_v34 }
 0x212   : > { %v974_v32 = vadd.f32 %v966_v51, %v894_v1  ;;  %v2517_v47 = vsel %vm865_vm9, %v1961_v38, %v873_v19  ;;  %v877_v31 = vmul.f32 %v1965_v9, %v2410_v23  ;;  %v2854_v1 = vmax.f32 %v2384_v22, 0.0 }
 0x213   : > { %vm911_vm4 = vcmp.lt.f32.partialorder %v2855_v6, 0.0004427343  ;;  %v2535_v62 = vsel %vm867_vm12, %v1963_v10, %v875_v17  ;;  %v2857_v23 = vmax.f32 %v2380_v3, 0.0  ;;  %v903_v22 = vsel %vm902_vm5, %v2456_v26, %v897_v42  ;;  %v1007_v26 = vpop.permute.xlu1 %1006 }
 0x214   : > { %1050 = vmatprep.subr.mxu0 %v974_v32  ;;  %v972_v38 = vadd.f32 %v948_v53, %v2854_v1  ;;  %v912_v5 = vsel %vm911_vm4, %v909_v43, %v906_v0  ;;  %v2543_v63 = vsel %vm869_vm15, %v1965_v9, %v877_v31  ;;  %v888_v34 = vmax.f32 %v2372_v39, 0.0 }
 0x215   : > { %v971_v44 = vadd.f32 %v939_v29, %v2857_v23  ;;  %1051 = vmatpush1.msra.mxu0 %v973_v57  ;;  %v969_v3 = vadd.f32 %v921_v12, %v2859_v27  ;;  %v967_v61 = vadd.f32 %v903_v22, %v887_v52  ;;  %v2860_v39 = vmov 0.0  }
 0x216   : > { %1052 = vmatprep.subr.mxu0 %v972_v38  ;;  %v968_v16 = vadd.f32 %v912_v5, %v888_v34 }
 0x217   : > { %1053 = vmatpush1.msra.mxu0 %v971_v44  ;;  %v997_v35 = vpop.permute.xlu1 %996 }
 0x218   : > { %1054 = vmatprep.subr.mxu0 %v970_v14 }
 0x219   : > { %1055 = vmatpush1.msra.mxu0 %v969_v3 }
 0x21a   : > { %1056 = vmatprep.subr.mxu0 %v968_v16 }
 0x21b   : > { %1057 = vmatpush1.msra.mxu0 %v967_v61 }
 0x21c   : > { %1837 = vmatmul.mubr.msk.f32.vlgmr.msra.gmra.mxu0 %vm705_vm3, %v1829_v20 }
 0x21d   : > { %1096 = vmatprep.mubr.f32.mxu0 %v2860_v39 }
 0x220   : > { %1838 = vmatmul.mubr.msk.f32.gmra.mxu0 %vm705_vm3, %v1830_v18 }
 0x221   : > { %1102 = vmatprep.mubr.f32.mxu0 %v2860_v39 }
 0x224   : > { %1839 = vmatmul.mubr.msk.f32.gmra.mxu0 %vm705_vm3, %v1831_v50 }
 0x225   : > { %1108 = vmatprep.mubr.f32.mxu0 %v2860_v39 }
 0x228   : > { %1840 = vmatmul.mubr.msk.f32.gmra.mxu0 %vm705_vm3, %v1832_v60 }
 0x229   : > { %1615 = vmatprep.mubr.f32.mxu0 %v2860_v39 }
 0x2dc   : > { %v1092_v37 = vpop.f32.mrf.mxu0 }
 0x2dd   : > { %v2572_v59 = vadd.f32 %v1092_v37, %v997_v35 }
 0x2de   : > { %v1094_v36 = vpop.f32.mrf.mxu0 }
 0x2df   : > { %v1115_v15 = vand.u32 2147483647, %v2572_v59  ;;  %v2575_v28 = vadd.f32 %v1094_v36, %v997_v35 }
 0x2e0   : > { %v1098_v48 = vpop.f32.mrf.mxu0 }
 0x2e1   : > { %v1116_v46 = vand.u32 2147483647, %v2575_v28  ;;  %v1123_v19 = vsub.f32 0.0, %v1115_v15  ;;  %v2578_v10 = vadd.f32 %v1098_v48, %v1002_v25 }
 0x2e2   : > { %v1100_v42 = vpop.f32.mrf.mxu0 }
 0x2e3   : > { %v2580_v51 = vadd.f32 %v1100_v42, %v1002_v25  ;;  %v1124_v53 = vsub.f32 0.0, %v1116_v46  ;;  %v1117_v0 = vand.u32 2147483647, %v2578_v10  ;;  %v1131_v32 = vmul.f32 1.442695, %v1123_v19 }
 0x2e4   : > { %v1104_v9 = vpop.f32.mrf.mxu0  ;;  %vm1173_vm5 = vcmp.ge.f32.partialorder %v2578_v10, 0.0 }
 0x2e5   : > { %v1118_v29 = vand.u32 2147483647, %v2580_v51  ;;  %v1125_v17 = vsub.f32 0.0, %v1117_v0  ;;  %v2584_v7 = vadd.f32 %v1104_v9, %v1007_v26  ;;  %v1133_v43 = vmul.f32 1.442695, %v1124_v53 }
 0x2e6   : > { %v1106_v57 = vpop.f32.mrf.mxu0  ;;  %1966 = vpow2.f32 %v1131_v32  ;;  %vm1174_vm4 = vcmp.ge.f32.partialorder %v2580_v51, 0.0 }
 0x2e7   : > { %v2586_v56 = vadd.f32 %v1106_v57, %v1007_v26  ;;  %v1126_v31 = vsub.f32 0.0, %v1118_v29  ;;  %v1119_v12 = vand.u32 2147483647, %v2584_v7  ;;  %v1135_v38 = vmul.f32 1.442695, %v1125_v17 }
 0x2e8   : > { %v1110_v1 = vpop.f32.mrf.mxu0  ;;  %1968 = vpow2.f32 %v1133_v43  ;;  %vm1175_vm2 = vcmp.ge.f32.partialorder %v2584_v7, 0.0 }
 0x2e9   : > { %v1120_v6 = vand.u32 2147483647, %v2586_v56  ;;  %v1127_v41 = vsub.f32 0.0, %v1119_v12  ;;  %v2590_v23 = vadd.f32 %v1110_v1, %v1012_v55  ;;  %v1137_v34 = vmul.f32 1.442695, %v1126_v31 }
 0x2ea   : > { %v1112_v44 = vpop.f32.mrf.mxu0  ;;  %1970 = vpow2.f32 %v1135_v38  ;;  %vm1176_vm1 = vcmp.ge.f32.partialorder %v2586_v56, 0.0 }
 0x2eb   : > { %v1128_v5 = vsub.f32 0.0, %v1120_v6  ;;  %v2592_v22 = vadd.f32 %v1112_v44, %v1012_v55  ;;  %v1139_v49 = vmul.f32 1.442695, %v1127_v41  ;;  %v1121_v14 = vand.u32 2147483647, %v2590_v23 }
 0x2ec   : > { %vm1177_vm15 = vcmp.ge.f32.partialorder %v2590_v23, 0.0 }
 0x2ed   : > { %v1141_v52 = vmul.f32 1.442695, %v1128_v5  ;;  %v1122_v27 = vand.u32 2147483647, %v2592_v22  ;;  %1972 = vpow2.f32 %v1139_v49  ;;  %v1129_v3 = vsub.f32 0.0, %v1121_v14 }
 0x2ee   : > { %1974 = vpow2.f32 %v1137_v34  ;;  %vm1178_vm14 = vcmp.ge.f32.partialorder %v2592_v22, 0.0 }
 0x2ef   : > { %v1130_v16 = vsub.f32 0.0, %v1122_v27  ;;  %v1143_v61 = vmul.f32 1.442695, %v1129_v3  ;;  %1976 = vpow2.f32 %v1141_v52 }
 0x2f1   : > { %v1145_v20 = vmul.f32 1.442695, %v1130_v16  ;;  %1978 = vpow2.f32 %v1143_v61 }
 0x2f3   : > { %1980 = vpow2.f32 %v1145_v20  ;;  %v2596_v18 = vpop.eup %1966 }
 0x2f4   : > { %v1147_v26 = vadd.f32 1.0, %v2596_v18  ;;  %v1206_v57 = vmul.f32 -0.5, %v2596_v18  ;;  %v1209_v20 = vand.u32 2147483647, %v2596_v18 }
 0x2f5   : > { %v2598_v50 = vpop.eup %1968 }
 0x2f6   : > { %v1148_v35 = vadd.f32 1.0, %v2598_v50  ;;  %1982 = vrcp.f32 %v1147_v26  ;;  %v1215_v14 = vmul.f32 -0.5, %v2598_v50  ;;  %v1207_v27 = vadd.f32 1.0, %v1206_v57 }
 0x2f7   : > { %v2600_v60 = vpop.eup %1970  ;;  %1984 = vlog2.f32 %v1147_v26  ;;  %v1218_v9 = vand.u32 2147483647, %v2598_v50  ;;  %vm2698_vm13 = vcmp.lt.f32.partialorder %v1209_v20, 0.0004427343  ;;  %v2879_v20 = vmax.f32 %v2580_v51, 0.0 }
 0x2f8   : > { %v1149_v36 = vadd.f32 1.0, %v2600_v60  ;;  %1986 = vlog2.f32 %v1148_v35  ;;  %v1224_v12 = vmul.f32 -0.5, %v2600_v60  ;;  %v1227_v3 = vand.u32 2147483647, %v2600_v60 }
 0x2f9   : > { %v1216_v17 = vadd.f32 1.0, %v1215_v14  ;;  %v2645_v31 = vmul.f32 %v2596_v18, %v1207_v27  ;;  %vm2694_vm12 = vcmp.lt.f32.partialorder %v1218_v9, 0.0004427343 }
 0x2fa   : > { %v2603_v55 = vpop.eup %1972  ;;  %1988 = vlog2.f32 %v1149_v36  ;;  %v1225_v26 = vadd.f32 1.0, %v1224_v12  ;;  %vm2647_vm6 = vcmp.lt.f32.partialorder %v1227_v3, 0.0004427343 }
 0x2fb   : > { %v2606_v37 = vpop.eup %1974  ;;  %v1151_v48 = vadd.f32 1.0, %v2603_v55  ;;  %v1242_v6 = vmul.f32 -0.5, %v2603_v55 }
 0x2fc   : > { %v2609_v15 = vpop.eup %1976  ;;  %v1150_v0 = vadd.f32 1.0, %v2606_v37  ;;  %v1233_v44 = vmul.f32 -0.5, %v2606_v37  ;;  %v1236_v16 = vand.u32 2147483647, %v2606_v37 }
 0x2fd   : > { %1990 = vlog2.f32 %v1151_v48  ;;  %v1152_v53 = vadd.f32 1.0, %v2609_v15  ;;  %v1251_v49 = vmul.f32 -0.5, %v2609_v15  ;;  %v1254_v14 = vand.u32 2147483647, %v2609_v15 }
 0x2fe   : > { %v2612_v25 = vpop.eup %1978  ;;  %vm2652_vm7 = vcmp.lt.f32.partialorder %v1236_v16, 0.0004427343 }
 0x2ff   : > { %v1153_v19 = vadd.f32 1.0, %v2612_v25  ;;  %v1260_v41 = vmul.f32 -0.5, %v2612_v25  ;;  %v1252_v32 = vadd.f32 1.0, %v1251_v49  ;;  %vm2673_vm11 = vcmp.lt.f32.partialorder %v1254_v14, 0.0004427343 }
 0x300   : > { %v2614_v46 = vpop.eup %1980 }
 0x301   : > { %v1154_v42 = vadd.f32 1.0, %v2614_v46  ;;  %1992 = vlog2.f32 %v1153_v19  ;;  %v1269_v34 = vmul.f32 -0.5, %v2614_v46 }
 0x303   : > { %1994 = vrcp.f32 %v1154_v42  ;;  %v2633_v5 = vpop.eup %1982  ;;  %v1270_v57 = vadd.f32 1.0, %v1269_v34  ;;  %v2873_v34 = vmax.f32 %v2586_v56, 0.0 }
 0x304   : > { %1996 = vlog2.f32 %v1154_v42  ;;  %v1985_v52 = vpop.eup %1984  ;;  %v1243_v42 = vadd.f32 1.0, %v1242_v6  ;;  %v1179_v56 = vmul.f32 %v2633_v5, %v2596_v18 }
 0x305   : > { %1998 = vlog2.f32 %v1152_v53  ;;  %v1987_v61 = vpop.eup %1986  ;;  %v1205_v58 = vmul.f32 0.6931472, %v1985_v52 }
 0x306   : > { %2000 = vlog2.f32 %v1150_v0  ;;  %v1244_v1 = vmul.f32 %v2603_v55, %v1243_v42  ;;  %v1214_v13 = vmul.f32 0.6931472, %v1987_v61 }
 0x307   : > { %2002 = vrcp.f32 %v1153_v19  ;;  %v1989_v19 = vpop.eup %1988  ;;  %v1211_v9 = vsel %vm2698_vm13, %v2645_v31, %v1205_v58 }
 0x308   : > { %2004 = vrcp.f32 %v1152_v53  ;;  %v1261_v53 = vadd.f32 1.0, %v1260_v41  ;;  %v1223_v11 = vmul.f32 0.6931472, %v1989_v19  ;;  %v2871_v19 = vmax.f32 %v2592_v22, 0.0 }
 0x309   : > { %2006 = vrcp.f32 %v1151_v48  ;;  %v1245_v48 = vand.u32 2147483647, %v2603_v55  ;;  %v2881_v22 = vmax.f32 %v2575_v28, 0.0 }
 0x30a   : > { %2008 = vrcp.f32 %v1150_v0  ;;  %v1234_v0 = vadd.f32 1.0, %v1233_v44  ;;  %v1991_v29 = vpop.eup %1990  ;;  %v1226_v44 = vmul.f32 %v2600_v60, %v1225_v26  ;;  %v1262_v38 = vmul.f32 %v2612_v25, %v1261_v53 }
 0x30b   : > { %2010 = vrcp.f32 %v1149_v36  ;;  %v1263_v36 = vand.u32 2147483647, %v2612_v25  ;;  %vm2657_vm8 = vcmp.lt.f32.partialorder %v1245_v48, 0.0004427343  ;;  %v1241_v3 = vmul.f32 0.6931472, %v1991_v29 }
 0x30c   : > { %2012 = vrcp.f32 %v1148_v35  ;;  %v1272_v35 = vand.u32 2147483647, %v2614_v46  ;;  %v1235_v16 = vmul.f32 %v2606_v37, %v1234_v0  ;;  %v1271_v48 = vmul.f32 %v2614_v46, %v1270_v57 }
 0x30d   : > { %vm2665_vm9 = vcmp.lt.f32.partialorder %v1263_v36, 0.0004427343  ;;  %v2882_v0 = vmax.f32 %v2572_v59, 0.0 }
 0x30e   : > { %v1993_v43 = vpop.eup %1992  ;;  %vm1273_vm10 = vcmp.lt.f32.partialorder %v1272_v35, 0.0004427343 }
 0x30f   : > { %v1259_v49 = vmul.f32 0.6931472, %v1993_v43  ;;  %v1253_v43 = vmul.f32 %v2609_v15, %v1252_v32  ;;  %v1247_v32 = vsel %vm2657_vm8, %v1244_v1, %v1241_v3  ;;  %v1229_v1 = vsel %vm2647_vm6, %v1226_v44, %v1223_v11 }
 0x310   : > { %v1995_v41 = vpop.eup %1994  ;;  %vm1172_vm6 = vcmp.ge.f32.partialorder %v2575_v28, 0.0 }
 0x311   : > { %v1997_v27 = vpop.eup %1996  ;;  %v1265_v29 = vsel %vm2665_vm9, %v1262_v38, %v1259_v49  ;;  %v2872_v38 = vmax.f32 %v2590_v23, 0.0  ;;  %v1186_v52 = vmul.f32 %v1995_v41, %v2614_v46  ;;  %v2878_v46 = vmax.f32 %v2584_v7, 0.0  ;;  %v1292_v23 = vld [vmem:[%s2820_s7] sm:$0x3] }
 0x312   : > { %v1999_v30 = vpop.eup %1998  ;;  %v1268_v26 = vmul.f32 0.6931472, %v1997_v27 }
 0x313   : > { %v2001_v54 = vpop.eup %2000  ;;  %v1250_v42 = vmul.f32 0.6931472, %v1999_v30  ;;  %v1281_v35 = vadd.f32 %v1265_v29, %v2872_v38 }
 0x314   : > { %v2003_v53 = vpop.eup %2002  ;;  %v1274_v21 = vsel %vm1273_vm10, %v1271_v48, %v1268_v26  ;;  %v1232_v36 = vmul.f32 0.6931472, %v2001_v54  ;;  %v1217_v54 = vmul.f32 %v2598_v50, %v1216_v17  ;;  %v1279_v17 = vadd.f32 %v1247_v32, %v2878_v46  ;;  %v1403_v48 = vpop.permute.xlu0 %1402 }
 0x315   : > { %v2005_v27 = vpop.eup %2004  ;;  %v1282_v57 = vadd.f32 %v1274_v21, %v2871_v19  ;;  %v1256_v40 = vsel %vm2673_vm11, %v1253_v43, %v1250_v42  ;;  %v1185_v21 = vmul.f32 %v2003_v53, %v2612_v25  ;;  %v2880_v43 = vmax.f32 %v2578_v10, 0.0  ;;  %v1398_v42 = vpop.permute.xlu1 %1397 }
 0x316   : > { %v2007_v30 = vpop.eup %2006  ;;  %v1238_v49 = vsel %vm2652_vm7, %v1235_v16, %v1232_v36  ;;  %v1280_v14 = vadd.f32 %v1256_v40, %v2873_v34  ;;  %v1220_v11 = vsel %vm2694_vm12, %v1217_v54, %v1214_v13  ;;  %v1184_v25 = vmul.f32 %v2005_v27, %v2609_v15 }
 0x317   : > { %v2009_v61 = vpop.eup %2008  ;;  %1326 = vmatprep.subr.mxu1 %v1282_v57  ;;  %v1183_v44 = vmul.f32 %v2007_v30, %v2603_v55  ;;  %v1278_v26 = vadd.f32 %v1238_v49, %v2879_v20  ;;  %v1277_v29 = vadd.f32 %v1229_v1, %v2880_v43  ;;  %v1194_v13 = vsel %vm1178_vm14, %v1995_v41, %v1186_v52  ;;  %v1845_v49 = vld [vmem:[%s2818_s5 + $0x38] sm:$0xff] }
 0x318   : > { %v2011_v6 = vpop.eup %2010  ;;  %1327 = vmatpush1.msra.mxu1 %v1281_v35  ;;  %v1182_v15 = vmul.f32 %v2009_v61, %v2606_v37  ;;  %v1193_v55 = vsel %vm1177_vm15, %v2003_v53, %v1185_v21  ;;  %v1276_v31 = vadd.f32 %v1220_v11, %v2881_v22  ;;  %v1275_v36 = vadd.f32 %v1211_v9, %v2882_v0  ;;  %v1844_v35 = vld [vmem:[%s2818_s5 + $0x30] sm:$0xff]  ;;  %v2885_v22 = vld [vmem:[#allocation7_spill] sm:$0xff] }
 0x319   : > { %v2013_v12 = vpop.eup %2012  ;;  %1328 = vmatprep.subr.mxu1 %v1280_v14  ;;  %v1181_v58 = vmul.f32 %v2011_v6, %v2600_v60  ;;  %v1192_v37 = vsel %vm1176_vm1, %v2005_v27, %v1184_v25  ;;  %v1191_v41 = vsel %vm1175_vm2, %v2007_v30, %v1183_v44  ;;  %v1412_v53 = vmul.f32 %v1403_v48, %v1194_v13  ;;  %v1393_v27 = vpop.permute.xlu0 %1392 }
 0x31a   : > { %1329 = vmatpush1.msra.mxu1 %v1279_v17  ;;  %v1180_v60 = vmul.f32 %v2013_v12, %v2598_v50  ;;  %v1411_v7 = vmul.f32 %v1403_v48, %v1193_v55  ;;  %v1190_v32 = vsel %vm1174_vm4, %v2009_v61, %v1182_v15  ;;  %v1410_v50 = vmul.f32 %v1398_v42, %v1192_v37  ;;  %v1388_v40 = vpop.permute.xlu1 %1387  ;;  %v2883_v15 = vld [vmem:[#allocation9_spill] sm:$0xff]  ;;  %v2884_v55 = vld [vmem:[#allocation8_spill] sm:$0xff] }
 0x31b   : > { %1330 = vmatprep.subr.mxu1 %v1278_v26  ;;  %v1189_v19 = vsel %vm1173_vm5, %v2011_v6, %v1181_v58  ;;  %vm1171_vm7 = vcmp.ge.f32.partialorder %v2572_v59, 0.0  ;;  %v1409_v51 = vmul.f32 %v1398_v42, %v1191_v41  ;;  %v1408_v57 = vmul.f32 %v1393_v27, %v1190_v32  ;;  %v1842_v59 = vld [vmem:[%s2818_s5 + $0x20] sm:$0xff]  ;;  %v2886_v42 = vld [vmem:[#allocation6_spill] sm:$0xff]  ;;  %v2888_v37 = vld [vmem:[#allocation4_spill] sm:$0xff] }
 0x31c   : > { %1331 = vmatpush1.msra.mxu1 %v1277_v29  ;;  %v1188_v18 = vsel %vm1172_vm6, %v2013_v12, %v1180_v60  ;;  %v1187_v10 = vsel %vm1171_vm7, %v2633_v5, %v1179_v56  ;;  %v1407_v28 = vmul.f32 %v1393_v27, %v1189_v19  ;;  %v1843_v5 = vld [vmem:[%s2818_s5 + $0x28] sm:$0xff]  ;;  %v2889_v56 = vld [vmem:[#allocation3_spill] sm:$0xff] }
 0x31d   : > { %1332 = vmatprep.subr.mxu1 %v1276_v31  ;;  %v1406_v30 = vmul.f32 %v1388_v40, %v1188_v18  ;;  %v1405_v38 = vmul.f32 %v1388_v40, %v1187_v10  ;;  %v1297_v32 = vpop.permute.xlu0 %1296 }
 0x31e   : > { %1333 = vmatpush1.msra.mxu1 %v1275_v36  ;;  %v2887_v36 = vld [vmem:[#allocation5_spill] sm:$0xff] }
 0x31f   : > { %1841 = vmatmul.mubr.msk.f32.vlgmr.msra.gmra.mxu1 %vm705_vm3, %v1292_v23  ;;  %1454 = vmatprep.subr.mxu1 %v1412_v53  ;;  %v1731_v53 = vlaneseq }
 0x320   : > { %1455 = vmatpush1.msra.mxu1 %v1411_v7  ;;  %1494 = vmatprep.mubr.f32.mxu1 %v2860_v39 }
 0x321   : > { %1456 = vmatprep.subr.mxu1 %v1410_v50  ;;  %v1732_v7 = vshrl.u32 %v1731_v53, 7 }
 0x322   : > { %1457 = vmatpush1.msra.mxu1 %v1409_v51 }
 0x323   : > { %1458 = vmatprep.subr.mxu1 %v1408_v57  ;;  %v1733_v50 = vsub.s32 0, %v1732_v7 }
 0x324   : > { %1459 = vmatpush1.msra.mxu1 %v1407_v28 }
 0x325   : > { %1460 = vmatprep.subr.mxu1 %v1406_v30 }
 0x326   : > { %1461 = vmatpush1.msra.mxu1 %v1405_v38 }
 0x327   : > { %1846 = vmatmul.mubr.msk.f32.vlgmr.msra.gmra.mxu1 %vm705_vm3, %v1842_v59 }
 0x328   : > { %1500 = vmatprep.mubr.f32.mxu1 %v2860_v39 }
 0x32b   : > { %1847 = vmatmul.mubr.msk.f32.gmra.mxu1 %vm705_vm3, %v1843_v5 }
 0x32c   : > { %1506 = vmatprep.mubr.f32.mxu1 %v2860_v39 }
 0x32f   : > { %1848 = vmatmul.mubr.msk.f32.gmra.mxu1 %vm705_vm3, %v1844_v35 }
 0x330   : > { %1512 = vmatprep.mubr.f32.mxu1 %v2860_v39 }
 0x333   : > { %1849 = vmatmul.mubr.msk.f32.gmra.mxu1 %vm705_vm3, %v1845_v49 }
 0x334   : > { %1724 = vmatprep.mubr.f32.mxu1 %v2860_v39 }
 0x3df   : > { %v2758_v54 = vpop.f32.mrf.mxu1 }
 0x3e0   : > { %v1369_v19 = vadd.f32 %v2758_v54, %v1297_v32 }
 0x3e1   : > { %v2760_v52 = vpop.f32.mrf.mxu1 }
 0x3e2   : > { %v1371_v27 = vadd.f32 %v2760_v52, %v1297_v32  ;;  %v1734_v51 = vrot.slane %v1369_v19, %v1733_v50  ;;  %v1743_v28 = vrot.slane %v1369_v19, 6 }
 0x3e4   : > { %v1738_v57 = vrot.slane %v1371_v27, %v1733_v50  ;;  %v1744_v30 = vrot.slane %v1371_v27, 6 }
 0x3e7   : > { %v1496_v61 = vpop.f32.mrf.mxu1 }
 0x3e8   : > { %v1527_v20 = vmul.f32 %v1496_v61, %v2431_v2  ;;  %v1537_v2 = vld [vmem:[%s2818_s5 + $0x10] sm:$0xff] }
 0x3e9   : > { %v1498_v1 = vpop.f32.mrf.mxu1 }
 0x3ea   : > { %v1528_v44 = vmul.f32 %v1498_v1, %v2443_v24  ;;  %v1538_v24 = vld [vmem:[%s2818_s5 + $0x18] sm:$0xff] }
 0x3eb   : > { %v1502_v21 = vpop.f32.mrf.mxu1 }
 0x3ec   : > { %v1529_v9 = vmul.f32 %v1502_v21, %v2517_v47 }
 0x3ed   : > { %v1504_v34 = vpop.f32.mrf.mxu1 }
 0x3ee   : > { %v1530_v12 = vmul.f32 %v1504_v34, %v2462_v33  ;;  %v1536_v33 = vld [vmem:[%s2818_s5 + $0x8] sm:$0xff] }
 0x3ef   : > { %v1508_v14 = vpop.f32.mrf.mxu1 }
 0x3f0   : > { %v1531_v25 = vmul.f32 %v1508_v14, %v2535_v62 }
 0x3f1   : > { %v1510_v3 = vpop.f32.mrf.mxu1 }
 0x3f2   : > { %v1532_v11 = vmul.f32 %v1510_v3, %v2495_v45  ;;  %v1535_v45 = vld [vmem:[%s2818_s5] sm:$0xff] }
 0x3f3   : > { %v1514_v6 = vpop.f32.mrf.mxu1 }
 0x3f4   : > { %v1533_v17 = vmul.f32 %v1514_v6, %v2543_v63 }
 0x3f5   : > { %v1516_v16 = vpop.f32.mrf.mxu1 }
 0x3f6   : > { %v1534_v46 = vmul.f32 %v1516_v16, %v2506_v8 }
 0x3f8   : > { %1575 = vmatprep.subr.mxu0 %v1534_v46 }
 0x3f9   : > { %1576 = vmatpush1.msra.mxu0 %v1533_v17 }
 0x3fa   : > { %1577 = vmatprep.subr.mxu0 %v1532_v11 }
 0x3fb   : > { %1578 = vmatpush1.msra.mxu0 %v1531_v25 }
 0x3fc   : > { %1579 = vmatprep.subr.mxu0 %v1530_v12 }
 0x3fd   : > { %1580 = vmatpush1.msra.mxu0 %v1529_v9 }
 0x3fe   : > { %1581 = vmatprep.subr.mxu0 %v1528_v44 }
 0x3ff   : > { %1582 = vmatpush1.msra.mxu0 %v1527_v20 }
 0x400   : > { %1850 = vmatmul.mubr.msk.f32.vlgmr.msra.gmra.mxu0 %vm705_vm3, %v1535_v45 }
 0x401   : > { %1621 = vmatprep.mubr.f32.mxu0 %v2860_v39 }
 0x404   : > { %1851 = vmatmul.mubr.msk.f32.gmra.mxu0 %vm705_vm3, %v1536_v33 }
 0x405   : > { %1627 = vmatprep.mubr.f32.mxu0 %v2860_v39 }
 0x408   : > { %1852 = vmatmul.mubr.msk.f32.gmra.mxu0 %vm705_vm3, %v1537_v2 }
 0x409   : > { %1633 = vmatprep.mubr.f32.mxu0 %v2860_v39 }
 0x40c   : > { %1853 = vmatmul.mubr.msk.f32.gmra.mxu0 %vm705_vm3, %v1538_v24 }
 0x4c0   : > { %v1617_v8 = vpop.f32.mrf.mxu0 }
 0x4c1   : > { %v1648_v41 = vmul.f32 %v1617_v8, %v2889_v56 }
 0x4c2   : > { %v1619_v47 = vpop.f32.mrf.mxu0 }
 0x4c3   : > { %v1649_v60 = vmul.f32 %v1619_v47, %v2888_v37 }
 0x4c4   : > { %v1623_v62 = vpop.f32.mrf.mxu0 }
 0x4c5   : > { %v1650_v23 = vmul.f32 %v1623_v62, %v2887_v36 }
 0x4c6   : > { %v1625_v63 = vpop.f32.mrf.mxu0 }
 0x4c7   : > { %v1651_v0 = vmul.f32 %v1625_v63, %v2886_v42 }
 0x4c8   : > { %v1629_v26 = vpop.f32.mrf.mxu0 }
 0x4c9   : > { %v1652_v31 = vmul.f32 %v1629_v26, %v2885_v22 }
 0x4ca   : > { %v1631_v48 = vpop.f32.mrf.mxu0 }
 0x4cb   : > { %v1653_v39 = vmul.f32 %v1631_v48, %v2884_v55 }
 0x4cc   : > { %v1635_v43 = vpop.f32.mrf.mxu0 }
 0x4cd   : > { %v1654_v58 = vmul.f32 %v1635_v43, %v2883_v15 }
 0x4ce   : > { %v1637_v29 = vpop.f32.mrf.mxu0 }
 0x4cf   : > { %v1655_v13 = vmul.f32 %v1637_v29, %v2312_v4  ;;  %v1656_v4 = vld [vmem:[%s2815_s2] sm:$0x7] }
 0x4d1   : > { %1684 = vmatprep.subr.mxu1 %v1655_v13 }
 0x4d2   : > { %1685 = vmatpush1.msra.mxu1 %v1654_v58 }
 0x4d3   : > { %1686 = vmatprep.subr.mxu1 %v1653_v39 }
 0x4d4   : > { %1687 = vmatpush1.msra.mxu1 %v1652_v31 }
 0x4d5   : > { %1688 = vmatprep.subr.mxu1 %v1651_v0 }
 0x4d6   : > { %1689 = vmatpush1.msra.mxu1 %v1650_v23 }
 0x4d7   : > { %1690 = vmatprep.subr.mxu1 %v1649_v60 }
 0x4d8   : > { %1691 = vmatpush1.msra.mxu1 %v1648_v41 }
 0x4d9   : > { %1854 = vmatmul.mubr.msk.f32.vlgmr.msra.gmra.mxu1 %vm705_vm3, %v1656_v4 }
 0x599   : > { %v1726_v18 = vpop.f32.mrf.mxu1 }
 0x59a   : > { %v1739_v10 = vmul.f32 %v1734_v51, %v1726_v18 }
 0x59b   : > { %v1728_v40 = vpop.f32.mrf.mxu1 }
 0x59c   : > { %v1740_v38 = vmul.f32 %v1738_v57, %v1728_v40  ;;  %v1747_v59 = vsel %vm407_vm0, %v1739_v10, %v1743_v28 }
 0x59e   : > { %v1748_v5 = vsel %vm407_vm0, %v1740_v38, %v1744_v30 }
 0x59f   : > { %v1751_v35 = vcombine.low %v1747_v59, %v1748_v5 }
 0x5a1   : > { %1753 = vst [vmem:[%s361_s12] sm:$0xff] %v1751_v35 }
 0x5a2 PF: > { %s20_s13 = sadd.s32 1, %s2020_s13  }
 0x5a3   : > { %p17_p4 = scmp.ge.s32.totalorder %s20_s13, 4  }
 0x5a5   :  { %19 = sbr.rel (!%p17_p4) target bundleno = 1 (0x1), region = 95 }

</bundles_post_ra>
